<compile_context>
chip_gen: v7x
topology: tpu7x:2x2x1
jax: 0.10.0
libtpu: 0.0.40
codegen_flags: <defaults>
</compile_context>

<pallas_src>
import functools

import jax
import jax.numpy as jnp
from jax.experimental import pallas as pl
from jax.experimental.pallas import tpu as pltpu


# ---------------------------------------------------------------------------
# Kernel
# ---------------------------------------------------------------------------
def _layer_norm(x, gamma, beta, eps):
    # x: (S, D), gamma/beta: (1, D); all f32
    mu = jnp.mean(x, axis=-1, keepdims=True)
    var = jnp.mean((x - mu) ** 2, axis=-1, keepdims=True)
    return (x - mu) * jax.lax.rsqrt(var + eps) * gamma + beta


def encoder_layer_kernel(
    x_ref, bias_ref,
    wqkv_ref, bqkv_ref, wo_ref, bo_ref,
    g1_ref, be1_ref,
    w1_ref, b1_ref, w2_ref, b2_ref,
    g2_ref, be2_ref,
    out_ref,
    q_hsc, k_hsc, v_hsc, attn_sc,
    *, num_heads, head_dim, q_block, eps, compute_dtype,
):
    H, Dh, TQ = num_heads, head_dim, q_block
    cd = compute_dtype

    x = x_ref[0]                                       # (S, D) f32
    S, D = x.shape
    NQ = S // TQ

    # ---------------- self-attention block (post-norm) ----------------
    residual = x

    # Fused dense QKV projection: one full-width MXU matmul (S, D) @ (D, 3D).
    # (1/sqrt(Dh) already folded into the q slice of wqkv / bqkv at pack time.)
    qkv = jnp.dot(x.astype(cd), wqkv_ref[...].astype(cd),
                  preferred_element_type=jnp.float32) + bqkv_ref[...]   # (S, 3D)

    # Stage Q/K/V head-major (H, S, Dh) in VMEM scratch via plain lane slices
    # (static-index stores; no reshape/transpose relayouts).
    for h in range(H):
        q_hsc[h] = qkv[:, h * Dh:(h + 1) * Dh].astype(q_hsc.dtype)
        k_hsc[h] = qkv[:, D + h * Dh:D + (h + 1) * Dh].astype(k_hsc.dtype)
        v_hsc[h] = qkv[:, 2 * D + h * Dh:2 * D + (h + 1) * Dh].astype(v_hsc.dtype)

    # Query-tiled attention: only an (H, TQ, S) score block is live at a time.
    @pl.loop(0, NQ)
    def _(qb):
        row = pl.multiple_of(qb * TQ, TQ)
        qh = q_hsc[:, pl.ds(row, TQ), :]                                  # (H, TQ, Dh)

        s = jnp.einsum("hqd,hkd->hqk", qh, k_hsc[...],
                       preferred_element_type=jnp.float32)                # (H, TQ, S)
        s = s + bias_ref[...]                       # additive -1e9 key-padding bias
        m = jnp.max(s, axis=-1, keepdims=True)
        p = jnp.exp(s - m)
        denom = jnp.sum(p, axis=-1, keepdims=True)

        o = jnp.einsum("hqk,hkd->hqd", p.astype(cd), v_hsc[...],
                       preferred_element_type=jnp.float32)                # (H, TQ, Dh)
        # normalize after PV: H*TQ*Dh multiplies instead of H*TQ*S
        # (exact reciprocal keeps the tight f32 reference check; approx=True in prod)
        o = o * pl.reciprocal(denom, approx=False)

        # write back lane-dense (TQ, D): head h -> columns [h*Dh, (h+1)*Dh)
        for h in range(H):
            attn_sc[pl.ds(row, TQ), pl.ds(h * Dh, Dh)] = o[h]

    # Dense output projection: (S, D) @ (D, D); the head-sum happens in the MXU.
    attn = jnp.dot(attn_sc[...].astype(cd), wo_ref[...].astype(cd),
                   preferred_element_type=jnp.float32) + bo_ref[...]      # (S, D)

    x = residual + attn                              # dropout is identity (eval)
    x = _layer_norm(x, g1_ref[...], be1_ref[...], eps)

    # ---------------- feed-forward block ----------------
    residual = x
    # TODO(synk): for very large D*FFN, stream w1/w2 via pltpu.emit_pipeline over
    # the hidden dim instead of keeping both fully resident.
    h_act = jnp.dot(x.astype(cd), w1_ref[...].astype(cd),
                    preferred_element_type=jnp.float32) + b1_ref[...]
    h_act = jnp.maximum(h_act, 0.0)                  # relu activation_fn
    y = jnp.dot(h_act.astype(cd), w2_ref[...].astype(cd),
                preferred_element_type=jnp.float32) + b2_ref[...]
    x = residual + y
    x = _layer_norm(x, g2_ref[...], be2_ref[...], eps)

    out_ref[0] = x.astype(out_ref.dtype)


# ---------------------------------------------------------------------------
# One-time parameter packing (host/XLA side, free at run time)
# ---------------------------------------------------------------------------
def pack_params(params, num_heads, *, compute_dtype=jnp.bfloat16):
    D = params["wq"].shape[0]
    Dh = D // num_heads
    scale = jnp.float32(Dh ** -0.5)

    # Dense fused QKV weights: (D, 3D), 1/sqrt(Dh) folded into the q slice.
    wqkv = jnp.concatenate(
        [params["wq"] * scale, params["wk"], params["wv"]], axis=1).astype(compute_dtype)
    bqkv = jnp.concatenate(
        [params["bq"] * scale, params["bk"], params["bv"]], axis=1).astype(jnp.float32)

    return dict(
        wqkv=wqkv, bqkv=bqkv,
        wo=params["wo"].astype(compute_dtype),          # dense (D, D)
        bo=params["bo"].astype(jnp.float32),
        ln1_g=params["ln1_g"].astype(jnp.float32),
        ln1_b=params["ln1_b"].astype(jnp.float32),
        w1=params["w1"].astype(compute_dtype), b1=params["b1"].astype(jnp.float32),
        w2=params["w2"].astype(compute_dtype), b2=params["b2"].astype(jnp.float32),
        ln2_g=params["ln2_g"].astype(jnp.float32),
        ln2_b=params["ln2_b"].astype(jnp.float32),
    )


# ---------------------------------------------------------------------------
# Wrapper
# ---------------------------------------------------------------------------
def _default_vmem_limit_bytes():
    # ~7/8 of physical VMEM: ~112 MiB on v5e/v6e (128 MiB), ~56 MiB on v7x (64 MiB).
    try:
        cap = int(pltpu.get_tpu_info().vmem_capacity_bytes)
    except Exception:
        cap = 64 * 1024 * 1024
    return cap * 7 // 8


def transformer_encoder_layer(x_sbd, encoder_padding_mask, packed, *, num_heads,
                              eps=1e-5, compute_dtype=jnp.bfloat16, q_block=256,
                              vmem_limit_bytes=None):
    """x_sbd: (seq_len, batch, embed_dim); encoder_padding_mask: (batch, seq_len) bool."""
    S, B, D = x_sbd.shape
    Dh = D // num_heads

    x = jnp.transpose(x_sbd, (1, 0, 2)).astype(jnp.float32)          # (B, S, D)
    # key-padding additive bias pre-folded in the wrapper: (B, 1, S), -1e9 on pads
    bias3 = jnp.where(encoder_padding_mask, jnp.float32(-1e9),
                      jnp.float32(0.0)).reshape(B, 1, S)
    # TODO(synk): an optional attn_mask (strided attention) would be folded into
    # this same additive bias; the module default attn_mask=None is implemented.

    # query tile: use q_block when it evenly tiles S, otherwise a single block
    TQ = q_block if (q_block is not None and q_block < S and S % q_block == 0) else S

    if vmem_limit_bytes is None:
        vmem_limit_bytes = _default_vmem_limit_bytes()

    weight_args = (
        packed["wqkv"], packed["bqkv"], packed["wo"], packed["bo"],
        packed["ln1_g"], packed["ln1_b"],
        packed["w1"], packed["b1"], packed["w2"], packed["b2"],
        packed["ln2_g"], packed["ln2_b"],
    )

    def full_spec(shape):
        return pl.BlockSpec(shape, lambda b: (0,) * len(shape))

    kernel = functools.partial(
        encoder_layer_kernel, num_heads=num_heads, head_dim=Dh, q_block=TQ,
        eps=eps, compute_dtype=compute_dtype)

    # TODO(synk): on v7x (2 TCs) with B == 1, also expose a query-tile grid axis
    # marked "parallel" so both TensorCores stay busy.
    out = pl.pallas_call(
        kernel,
        out_shape=jax.ShapeDtypeStruct((B, S, D), jnp.float32),
        grid_spec=pltpu.PrefetchScalarGridSpec(
            num_scalar_prefetch=0,
            grid=(B,),
            in_specs=[
                pl.BlockSpec((1, S, D), lambda b: (b, 0, 0)),     # x
                pl.BlockSpec((1, 1, S), lambda b: (b, 0, 0)),     # key-padding bias
            ] + [full_spec(w.shape) for w in weight_args],
            out_specs=pl.BlockSpec((1, S, D), lambda b: (b, 0, 0)),
            scratch_shapes=[
                pltpu.VMEM((num_heads, S, Dh), compute_dtype),    # Q head-major
                pltpu.VMEM((num_heads, S, Dh), compute_dtype),    # K head-major
                pltpu.VMEM((num_heads, S, Dh), compute_dtype),    # V head-major
                pltpu.VMEM((S, D), jnp.float32),                  # attention output
            ]),
        compiler_params=pltpu.CompilerParams(
            dimension_semantics=("parallel",),                    # shard batch over TCs
            vmem_limit_bytes=vmem_limit_bytes,
        ),
    )(x, bias3, *weight_args)

    return jnp.transpose(out, (1, 0, 2))                          # back to (S, B, D)


# ---------------------------------------------------------------------------
# Pure-JAX reference (same math, unpacked params) for self-check
# ---------------------------------------------------------------------------
def reference(x_sbd, pad_mask, p, *, num_heads, eps=1e-5):
    S, B, D = x_sbd.shape
    Dh = D // num_heads
    x = jnp.transpose(x_sbd, (1, 0, 2)).astype(jnp.float32)
    bias = jnp.where(pad_mask[:, None, :], -1e9, 0.0).astype(jnp.float32)

    def ln(x, g, b):
        mu = jnp.mean(x, -1, keepdims=True)
        var = jnp.mean((x - mu) ** 2, -1, keepdims=True)
        return (x - mu) / jnp.sqrt(var + eps) * g + b

    res = x
    q = (x @ p["wq"] + p["bq"]) * Dh ** -0.5
    k = x @ p["wk"] + p["bk"]
    v = x @ p["wv"] + p["bv"]
    qh = q.reshape(B, S, num_heads, Dh).transpose(0, 2, 1, 3)
    kh = k.reshape(B, S, num_heads, Dh).transpose(0, 2, 1, 3)
    vh = v.reshape(B, S, num_heads, Dh).transpose(0, 2, 1, 3)
    s = qh @ kh.transpose(0, 1, 3, 2) + bias[:, None]
    a = jax.nn.softmax(s, axis=-1)
    o = (a @ vh).transpose(0, 2, 1, 3).reshape(B, S, D)
    o = o @ p["wo"] + p["bo"]
    x = ln(res + o, p["ln1_g"], p["ln1_b"])
    res = x
    h = jnp.maximum(x @ p["w1"] + p["b1"], 0.0)
    y = h @ p["w2"] + p["b2"]
    x = ln(res + y, p["ln2_g"], p["ln2_b"])
    return jnp.transpose(x, (1, 0, 2))


# ---------------------------------------------------------------------------
# Main
# ---------------------------------------------------------------------------
if __name__ == "__main__":
    SEQ, BATCH, EMBED, HEADS, FFN = 16, 2, 32, 4, 64

    key = jax.random.PRNGKey(0)
    ks = jax.random.split(key, 12)

    def w(k, shape, scale=0.05):
        return (scale * jax.random.normal(k, shape)).astype(jnp.float32)

    # weights stored as (in, out) so the math is x @ W + b
    params = {
        "wq": w(ks[0], (EMBED, EMBED)), "bq": w(ks[1], (1, EMBED)),
        "wk": w(ks[2], (EMBED, EMBED)), "bk": w(ks[3], (1, EMBED)),
        "wv": w(ks[4], (EMBED, EMBED)), "bv": w(ks[5], (1, EMBED)),
        "wo": w(ks[6], (EMBED, EMBED)), "bo": w(ks[7], (1, EMBED)),
        "ln1_g": jnp.ones((1, EMBED), jnp.float32),
        "ln1_b": jnp.zeros((1, EMBED), jnp.float32),
        "w1": w(ks[8], (EMBED, FFN)), "b1": w(ks[9], (1, FFN)),
        "w2": w(ks[10], (FFN, EMBED)), "b2": w(ks[11], (1, EMBED)),
        "ln2_g": jnp.ones((1, EMBED), jnp.float32),
        "ln2_b": jnp.zeros((1, EMBED), jnp.float32),
    }

    x = jax.random.normal(jax.random.PRNGKey(1), (SEQ, BATCH, EMBED), jnp.float32)
    # padding mask: (batch, seq), True/1 = padding.  Batch 1 has last 3 tokens padded.
    pad_mask = jnp.zeros((BATCH, SEQ), jnp.bool_).at[1, SEQ - 3:].set(True)

    # f32 compute for the tight reference check; compute_dtype=bf16 is the prod
    # default (2x MXU throughput, halved weight DMA) with f32 accumulation.
    packed = pack_params(params, HEADS, compute_dtype=jnp.float32)
    out = transformer_encoder_layer(x, pad_mask, packed, num_heads=HEADS,
                                    compute_dtype=jnp.float32,
                                    q_block=8)   # exercises 2 query tiles
    out = jax.block_until_ready(out)

    ref = reference(x, pad_mask, params, num_heads=HEADS)
    assert out.shape == (SEQ, BATCH, EMBED)
    assert jnp.allclose(out, ref, atol=1e-4, rtol=1e-4), (
        f"max abs err {jnp.max(jnp.abs(out - ref))}"
    )
    print("KERNEL_OK")
</pallas_src>

<mosaic_0001>
module attributes {stable_mosaic.version = 11 : i64} {
  func.func @encoder_layer_kernel(%arg0: i32, %arg1: memref<1x16x32xf32, #tpu.memory_space<vmem>>, %arg2: memref<1x1x16xf32, #tpu.memory_space<vmem>>, %arg3: memref<32x96xf32, #tpu.memory_space<vmem>>, %arg4: memref<1x96xf32, #tpu.memory_space<vmem>>, %arg5: memref<32x32xf32, #tpu.memory_space<vmem>>, %arg6: memref<1x32xf32, #tpu.memory_space<vmem>>, %arg7: memref<1x32xf32, #tpu.memory_space<vmem>>, %arg8: memref<1x32xf32, #tpu.memory_space<vmem>>, %arg9: memref<32x64xf32, #tpu.memory_space<vmem>>, %arg10: memref<1x64xf32, #tpu.memory_space<vmem>>, %arg11: memref<64x32xf32, #tpu.memory_space<vmem>>, %arg12: memref<1x32xf32, #tpu.memory_space<vmem>>, %arg13: memref<1x32xf32, #tpu.memory_space<vmem>>, %arg14: memref<1x32xf32, #tpu.memory_space<vmem>>, %arg15: memref<1x16x32xf32, #tpu.memory_space<vmem>>, %arg16: memref<4x16x8xf32, #tpu.memory_space<vmem>>, %arg17: memref<4x16x8xf32, #tpu.memory_space<vmem>>, %arg18: memref<4x16x8xf32, #tpu.memory_space<vmem>>, %arg19: memref<16x32xf32, #tpu.memory_space<vmem>>) attributes {dimension_semantics = [#tpu.dimension_semantics<parallel>], iteration_bounds = array<i64: 2>, scalar_prefetch = 0 : i64, scratch_operands = 4 : i64, tpu.core_type = #tpu.core_type<tc>, window_params = [{transform_indices = @transform_0, window_bounds = array<i64: 1, 16, 32>}, {transform_indices = @transform_1, window_bounds = array<i64: 1, 1, 16>}, {pipeline_mode = #tpu.pipeline_mode<synchronous>, transform_indices = @transform_2, window_bounds = array<i64: 32, 96>}, {pipeline_mode = #tpu.pipeline_mode<synchronous>, transform_indices = @transform_3, window_bounds = array<i64: 1, 96>}, {pipeline_mode = #tpu.pipeline_mode<synchronous>, transform_indices = @transform_4, window_bounds = array<i64: 32, 32>}, {pipeline_mode = #tpu.pipeline_mode<synchronous>, transform_indices = @transform_5, window_bounds = array<i64: 1, 32>}, {pipeline_mode = #tpu.pipeline_mode<synchronous>, transform_indices = @transform_6, window_bounds = array<i64: 1, 32>}, {pipeline_mode = #tpu.pipeline_mode<synchronous>, transform_indices = @transform_7, window_bounds = array<i64: 1, 32>}, {pipeline_mode = #tpu.pipeline_mode<synchronous>, transform_indices = @transform_8, window_bounds = array<i64: 32, 64>}, {pipeline_mode = #tpu.pipeline_mode<synchronous>, transform_indices = @transform_9, window_bounds = array<i64: 1, 64>}, {pipeline_mode = #tpu.pipeline_mode<synchronous>, transform_indices = @transform_10, window_bounds = array<i64: 64, 32>}, {pipeline_mode = #tpu.pipeline_mode<synchronous>, transform_indices = @transform_11, window_bounds = array<i64: 1, 32>}, {pipeline_mode = #tpu.pipeline_mode<synchronous>, transform_indices = @transform_12, window_bounds = array<i64: 1, 32>}, {pipeline_mode = #tpu.pipeline_mode<synchronous>, transform_indices = @transform_13, window_bounds = array<i64: 1, 32>}, {transform_indices = @transform_14, window_bounds = array<i64: 1, 16, 32>}]} {
    %c0 = arith.constant 0 : index
    %c0_0 = arith.constant 0 : index
    %c0_1 = arith.constant 0 : index
    %0 = vector.load %arg1[%c0, %c0_0, %c0_1] : memref<1x16x32xf32, #tpu.memory_space<vmem>>, vector<1x16x32xf32>
    %1 = vector.shape_cast %0 : vector<1x16x32xf32> to vector<16x32xf32>
    %c0_2 = arith.constant 0 : index
    %c0_3 = arith.constant 0 : index
    %2 = vector.load %arg3[%c0_2, %c0_3] : memref<32x96xf32, #tpu.memory_space<vmem>>, vector<32x96xf32>
    %cst = arith.constant dense<0.000000e+00> : vector<16x96xf32>
    %3 = tpu.matmul %1, %2, %cst {dimension_numbers = #tpu.dot_dimension_numbers<[1], [0], [0], [1], [0, 0, 1, 1], [], []>} : vector<16x32xf32>, vector<32x96xf32>, vector<16x96xf32> -> vector<16x96xf32>
    %c0_4 = arith.constant 0 : index
    %c0_5 = arith.constant 0 : index
    %4 = vector.load %arg4[%c0_4, %c0_5] : memref<1x96xf32, #tpu.memory_space<vmem>>, vector<1x96xf32>
    %5 = vector.broadcast %4 : vector<1x96xf32> to vector<16x96xf32>
    %6 = arith.addf %3, %5 : vector<16x96xf32>
    %7 = vector.extract_strided_slice %6 {offsets = [0, 0], sizes = [16, 8], strides = [1, 1]} : vector<16x96xf32> to vector<16x8xf32>
    %c0_6 = arith.constant 0 : index
    %c0_7 = arith.constant 0 : index
    %c0_8 = arith.constant 0 : index
    %8 = vector.load %arg16[%c0_6, %c0_7, %c0_8] : memref<4x16x8xf32, #tpu.memory_space<vmem>>, vector<1x16x8xf32>
    %9 = vector.shape_cast %8 : vector<1x16x8xf32> to vector<16x8xf32>
    %10 = vector.shape_cast %7 : vector<16x8xf32> to vector<1x16x8xf32>
    tpu.vector_store %arg16[%c0_6, %c0_7, %c0_8], %10 {strides = array<i32>} : memref<4x16x8xf32, #tpu.memory_space<vmem>>, vector<1x16x8xf32>,
    %11 = vector.extract_strided_slice %6 {offsets = [0, 32], sizes = [16, 8], strides = [1, 1]} : vector<16x96xf32> to vector<16x8xf32>
    %c0_9 = arith.constant 0 : index
    %c0_10 = arith.constant 0 : index
    %c0_11 = arith.constant 0 : index
    %12 = vector.load %arg17[%c0_9, %c0_10, %c0_11] : memref<4x16x8xf32, #tpu.memory_space<vmem>>, vector<1x16x8xf32>
    %13 = vector.shape_cast %12 : vector<1x16x8xf32> to vector<16x8xf32>
    %14 = vector.shape_cast %11 : vector<16x8xf32> to vector<1x16x8xf32>
    tpu.vector_store %arg17[%c0_9, %c0_10, %c0_11], %14 {strides = array<i32>} : memref<4x16x8xf32, #tpu.memory_space<vmem>>, vector<1x16x8xf32>,
    %15 = vector.extract_strided_slice %6 {offsets = [0, 64], sizes = [16, 8], strides = [1, 1]} : vector<16x96xf32> to vector<16x8xf32>
    %c0_12 = arith.constant 0 : index
    %c0_13 = arith.constant 0 : index
    %c0_14 = arith.constant 0 : index
    %16 = vector.load %arg18[%c0_12, %c0_13, %c0_14] : memref<4x16x8xf32, #tpu.memory_space<vmem>>, vector<1x16x8xf32>
    %17 = vector.shape_cast %16 : vector<1x16x8xf32> to vector<16x8xf32>
    %18 = vector.shape_cast %15 : vector<16x8xf32> to vector<1x16x8xf32>
    tpu.vector_store %arg18[%c0_12, %c0_13, %c0_14], %18 {strides = array<i32>} : memref<4x16x8xf32, #tpu.memory_space<vmem>>, vector<1x16x8xf32>,
    %19 = vector.extract_strided_slice %6 {offsets = [0, 8], sizes = [16, 8], strides = [1, 1]} : vector<16x96xf32> to vector<16x8xf32>
    %c1 = arith.constant 1 : index
    %c0_15 = arith.constant 0 : index
    %c0_16 = arith.constant 0 : index
    %20 = vector.load %arg16[%c1, %c0_15, %c0_16] : memref<4x16x8xf32, #tpu.memory_space<vmem>>, vector<1x16x8xf32>
    %21 = vector.shape_cast %20 : vector<1x16x8xf32> to vector<16x8xf32>
    %22 = vector.shape_cast %19 : vector<16x8xf32> to vector<1x16x8xf32>
    tpu.vector_store %arg16[%c1, %c0_15, %c0_16], %22 {strides = array<i32>} : memref<4x16x8xf32, #tpu.memory_space<vmem>>, vector<1x16x8xf32>,
    %23 = vector.extract_strided_slice %6 {offsets = [0, 40], sizes = [16, 8], strides = [1, 1]} : vector<16x96xf32> to vector<16x8xf32>
    %c1_17 = arith.constant 1 : index
    %c0_18 = arith.constant 0 : index
    %c0_19 = arith.constant 0 : index
    %24 = vector.load %arg17[%c1_17, %c0_18, %c0_19] : memref<4x16x8xf32, #tpu.memory_space<vmem>>, vector<1x16x8xf32>
    %25 = vector.shape_cast %24 : vector<1x16x8xf32> to vector<16x8xf32>
    %26 = vector.shape_cast %23 : vector<16x8xf32> to vector<1x16x8xf32>
    tpu.vector_store %arg17[%c1_17, %c0_18, %c0_19], %26 {strides = array<i32>} : memref<4x16x8xf32, #tpu.memory_space<vmem>>, vector<1x16x8xf32>,
    %27 = vector.extract_strided_slice %6 {offsets = [0, 72], sizes = [16, 8], strides = [1, 1]} : vector<16x96xf32> to vector<16x8xf32>
    %c1_20 = arith.constant 1 : index
    %c0_21 = arith.constant 0 : index
    %c0_22 = arith.constant 0 : index
    %28 = vector.load %arg18[%c1_20, %c0_21, %c0_22] : memref<4x16x8xf32, #tpu.memory_space<vmem>>, vector<1x16x8xf32>
    %29 = vector.shape_cast %28 : vector<1x16x8xf32> to vector<16x8xf32>
    %30 = vector.shape_cast %27 : vector<16x8xf32> to vector<1x16x8xf32>
    tpu.vector_store %arg18[%c1_20, %c0_21, %c0_22], %30 {strides = array<i32>} : memref<4x16x8xf32, #tpu.memory_space<vmem>>, vector<1x16x8xf32>,
    %31 = vector.extract_strided_slice %6 {offsets = [0, 16], sizes = [16, 8], strides = [1, 1]} : vector<16x96xf32> to vector<16x8xf32>
    %c2 = arith.constant 2 : index
    %c0_23 = arith.constant 0 : index
    %c0_24 = arith.constant 0 : index
    %32 = vector.load %arg16[%c2, %c0_23, %c0_24] : memref<4x16x8xf32, #tpu.memory_space<vmem>>, vector<1x16x8xf32>
    %33 = vector.shape_cast %32 : vector<1x16x8xf32> to vector<16x8xf32>
    %34 = vector.shape_cast %31 : vector<16x8xf32> to vector<1x16x8xf32>
    tpu.vector_store %arg16[%c2, %c0_23, %c0_24], %34 {strides = array<i32>} : memref<4x16x8xf32, #tpu.memory_space<vmem>>, vector<1x16x8xf32>,
    %35 = vector.extract_strided_slice %6 {offsets = [0, 48], sizes = [16, 8], strides = [1, 1]} : vector<16x96xf32> to vector<16x8xf32>
    %c2_25 = arith.constant 2 : index
    %c0_26 = arith.constant 0 : index
    %c0_27 = arith.constant 0 : index
    %36 = vector.load %arg17[%c2_25, %c0_26, %c0_27] : memref<4x16x8xf32, #tpu.memory_space<vmem>>, vector<1x16x8xf32>
    %37 = vector.shape_cast %36 : vector<1x16x8xf32> to vector<16x8xf32>
    %38 = vector.shape_cast %35 : vector<16x8xf32> to vector<1x16x8xf32>
    tpu.vector_store %arg17[%c2_25, %c0_26, %c0_27], %38 {strides = array<i32>} : memref<4x16x8xf32, #tpu.memory_space<vmem>>, vector<1x16x8xf32>,
    %39 = vector.extract_strided_slice %6 {offsets = [0, 80], sizes = [16, 8], strides = [1, 1]} : vector<16x96xf32> to vector<16x8xf32>
    %c2_28 = arith.constant 2 : index
    %c0_29 = arith.constant 0 : index
    %c0_30 = arith.constant 0 : index
    %40 = vector.load %arg18[%c2_28, %c0_29, %c0_30] : memref<4x16x8xf32, #tpu.memory_space<vmem>>, vector<1x16x8xf32>
    %41 = vector.shape_cast %40 : vector<1x16x8xf32> to vector<16x8xf32>
    %42 = vector.shape_cast %39 : vector<16x8xf32> to vector<1x16x8xf32>
    tpu.vector_store %arg18[%c2_28, %c0_29, %c0_30], %42 {strides = array<i32>} : memref<4x16x8xf32, #tpu.memory_space<vmem>>, vector<1x16x8xf32>,
    %43 = vector.extract_strided_slice %6 {offsets = [0, 24], sizes = [16, 8], strides = [1, 1]} : vector<16x96xf32> to vector<16x8xf32>
    %c3 = arith.constant 3 : index
    %c0_31 = arith.constant 0 : index
    %c0_32 = arith.constant 0 : index
    %44 = vector.load %arg16[%c3, %c0_31, %c0_32] : memref<4x16x8xf32, #tpu.memory_space<vmem>>, vector<1x16x8xf32>
    %45 = vector.shape_cast %44 : vector<1x16x8xf32> to vector<16x8xf32>
    %46 = vector.shape_cast %43 : vector<16x8xf32> to vector<1x16x8xf32>
    tpu.vector_store %arg16[%c3, %c0_31, %c0_32], %46 {strides = array<i32>} : memref<4x16x8xf32, #tpu.memory_space<vmem>>, vector<1x16x8xf32>,
    %47 = vector.extract_strided_slice %6 {offsets = [0, 56], sizes = [16, 8], strides = [1, 1]} : vector<16x96xf32> to vector<16x8xf32>
    %c3_33 = arith.constant 3 : index
    %c0_34 = arith.constant 0 : index
    %c0_35 = arith.constant 0 : index
    %48 = vector.load %arg17[%c3_33, %c0_34, %c0_35] : memref<4x16x8xf32, #tpu.memory_space<vmem>>, vector<1x16x8xf32>
    %49 = vector.shape_cast %48 : vector<1x16x8xf32> to vector<16x8xf32>
    %50 = vector.shape_cast %47 : vector<16x8xf32> to vector<1x16x8xf32>
    tpu.vector_store %arg17[%c3_33, %c0_34, %c0_35], %50 {strides = array<i32>} : memref<4x16x8xf32, #tpu.memory_space<vmem>>, vector<1x16x8xf32>,
    %51 = vector.extract_strided_slice %6 {offsets = [0, 88], sizes = [16, 8], strides = [1, 1]} : vector<16x96xf32> to vector<16x8xf32>
    %c3_36 = arith.constant 3 : index
    %c0_37 = arith.constant 0 : index
    %c0_38 = arith.constant 0 : index
    %52 = vector.load %arg18[%c3_36, %c0_37, %c0_38] : memref<4x16x8xf32, #tpu.memory_space<vmem>>, vector<1x16x8xf32>
    %53 = vector.shape_cast %52 : vector<1x16x8xf32> to vector<16x8xf32>
    %54 = vector.shape_cast %51 : vector<16x8xf32> to vector<1x16x8xf32>
    tpu.vector_store %arg18[%c3_36, %c0_37, %c0_38], %54 {strides = array<i32>} : memref<4x16x8xf32, #tpu.memory_space<vmem>>, vector<1x16x8xf32>,
    %c0_i32 = arith.constant 0 : i32
    %c2_i32 = arith.constant 2 : i32
    %55 = arith.addi %c0_i32, %c2_i32 : i32
    %c1_i32 = arith.constant 1 : i32
    scf.for %arg20 = %c0_i32 to %55 step %c1_i32  : i32 {
      %c1_i32_79 = arith.constant 1 : i32
      %127 = arith.muli %arg20, %c1_i32_79 : i32
      %c0_i32_80 = arith.constant 0 : i32
      %128 = arith.addi %c0_i32_80, %127 : i32
      %c8_i32 = arith.constant 8 : i32
      %129 = arith.muli %128, %c8_i32 : i32
      %130 = tpu.assume_multiple %129, 8 : i32
      %c0_81 = arith.constant 0 : index
      %131 = arith.index_cast %130 : i32 to index
      %c0_82 = arith.constant 0 : index
      %132 = vector.load %arg16[%c0_81, %131, %c0_82] : memref<4x16x8xf32, #tpu.memory_space<vmem>>, vector<4x8x8xf32>
      %c0_83 = arith.constant 0 : index
      %c0_84 = arith.constant 0 : index
      %c0_85 = arith.constant 0 : index
      %133 = vector.load %arg17[%c0_83, %c0_84, %c0_85] : memref<4x16x8xf32, #tpu.memory_space<vmem>>, vector<4x16x8xf32>
      "tpu.trace_start"() <{level = 10 : i32, message = "hqd,hkd->hqk"}> : () -> ()
      %cst_86 = arith.constant dense<0.000000e+00> : vector<4x8x16xf32>
      %134 = tpu.matmul %132, %133, %cst_86 {dimension_numbers = #tpu.dot_dimension_numbers<[2], [2], [1], [1], [0, 0, 0, 1, 1, 1], [0], [0]>} : vector<4x8x8xf32>, vector<4x16x8xf32>, vector<4x8x16xf32> -> vector<4x8x16xf32>
      "tpu.trace_stop"() : () -> ()
      %c0_87 = arith.constant 0 : index
      %c0_88 = arith.constant 0 : index
      %c0_89 = arith.constant 0 : index
      %135 = vector.load %arg2[%c0_87, %c0_88, %c0_89] : memref<1x1x16xf32, #tpu.memory_space<vmem>>, vector<1x1x16xf32>
      %136 = vector.broadcast %135 : vector<1x1x16xf32> to vector<4x8x16xf32>
      %137 = arith.addf %134, %136 : vector<4x8x16xf32>
      %cst_90 = arith.constant dense<0xFF800000> : vector<4x8xf32>
      %138 = vector.multi_reduction <maximumf>, %137, %cst_90 [2] : vector<4x8x16xf32> to vector<4x8xf32>
      %139 = vector.shape_cast %138 : vector<4x8xf32> to vector<4x8x1xf32>
      %140 = vector.broadcast %139 : vector<4x8x1xf32> to vector<4x8x16xf32>
      %141 = arith.subf %137, %140 : vector<4x8x16xf32>
      %142 = math.exp %141 : vector<4x8x16xf32>
      %cst_91 = arith.constant dense<0.000000e+00> : vector<4x8xf32>
      %143 = vector.multi_reduction <add>, %142, %cst_91 [2] : vector<4x8x16xf32> to vector<4x8xf32>
      %144 = vector.shape_cast %143 : vector<4x8xf32> to vector<4x8x1xf32>
      %c0_92 = arith.constant 0 : index
      %c0_93 = arith.constant 0 : index
      %c0_94 = arith.constant 0 : index
      %145 = vector.load %arg18[%c0_92, %c0_93, %c0_94] : memref<4x16x8xf32, #tpu.memory_space<vmem>>, vector<4x16x8xf32>
      "tpu.trace_start"() <{level = 10 : i32, message = "hqk,hkd->hqd"}> : () -> ()
      %cst_95 = arith.constant dense<0.000000e+00> : vector<4x8x8xf32>
      %146 = tpu.matmul %142, %145, %cst_95 {dimension_numbers = #tpu.dot_dimension_numbers<[2], [1], [1], [2], [0, 0, 0, 1, 1, 2], [0], [0]>} : vector<4x8x16xf32>, vector<4x16x8xf32>, vector<4x8x8xf32> -> vector<4x8x8xf32>
      "tpu.trace_stop"() : () -> ()
      %147 = tpu.reciprocal %144 : vector<4x8x1xf32> -> vector<4x8x1xf32>
      %148 = vector.broadcast %147 : vector<4x8x1xf32> to vector<4x8x8xf32>
      %149 = arith.mulf %146, %148 : vector<4x8x8xf32>
      %150 = vector.extract_strided_slice %149 {offsets = [0, 0, 0], sizes = [1, 8, 8], strides = [1, 1, 1]} : vector<4x8x8xf32> to vector<1x8x8xf32>
      %151 = vector.shape_cast %150 : vector<1x8x8xf32> to vector<8x8xf32>
      %152 = arith.index_cast %130 : i32 to index
      %c0_96 = arith.constant 0 : index
      %153 = vector.load %arg19[%152, %c0_96] : memref<16x32xf32, #tpu.memory_space<vmem>>, vector<8x8xf32>
      tpu.vector_store %arg19[%152, %c0_96], %151 {strides = array<i32>} : memref<16x32xf32, #tpu.memory_space<vmem>>, vector<8x8xf32>,
      %154 = vector.extract_strided_slice %149 {offsets = [1, 0, 0], sizes = [1, 8, 8], strides = [1, 1, 1]} : vector<4x8x8xf32> to vector<1x8x8xf32>
      %155 = vector.shape_cast %154 : vector<1x8x8xf32> to vector<8x8xf32>
      %156 = arith.index_cast %130 : i32 to index
      %c8 = arith.constant 8 : index
      %157 = vector.load %arg19[%156, %c8] : memref<16x32xf32, #tpu.memory_space<vmem>>, vector<8x8xf32>
      tpu.vector_store %arg19[%156, %c8], %155 {strides = array<i32>} : memref<16x32xf32, #tpu.memory_space<vmem>>, vector<8x8xf32>,
      %158 = vector.extract_strided_slice %149 {offsets = [2, 0, 0], sizes = [1, 8, 8], strides = [1, 1, 1]} : vector<4x8x8xf32> to vector<1x8x8xf32>
      %159 = vector.shape_cast %158 : vector<1x8x8xf32> to vector<8x8xf32>
      %160 = arith.index_cast %130 : i32 to index
      %c16 = arith.constant 16 : index
      %161 = vector.load %arg19[%160, %c16] : memref<16x32xf32, #tpu.memory_space<vmem>>, vector<8x8xf32>
      tpu.vector_store %arg19[%160, %c16], %159 {strides = array<i32>} : memref<16x32xf32, #tpu.memory_space<vmem>>, vector<8x8xf32>,
      %162 = vector.extract_strided_slice %149 {offsets = [3, 0, 0], sizes = [1, 8, 8], strides = [1, 1, 1]} : vector<4x8x8xf32> to vector<1x8x8xf32>
      %163 = vector.shape_cast %162 : vector<1x8x8xf32> to vector<8x8xf32>
      %164 = arith.index_cast %130 : i32 to index
      %c24 = arith.constant 24 : index
      %165 = vector.load %arg19[%164, %c24] : memref<16x32xf32, #tpu.memory_space<vmem>>, vector<8x8xf32>
      tpu.vector_store %arg19[%164, %c24], %163 {strides = array<i32>} : memref<16x32xf32, #tpu.memory_space<vmem>>, vector<8x8xf32>,
    }
    %c2_i32_39 = arith.constant 2 : i32
    %c0_40 = arith.constant 0 : index
    %c0_41 = arith.constant 0 : index
    %56 = vector.load %arg19[%c0_40, %c0_41] : memref<16x32xf32, #tpu.memory_space<vmem>>, vector<16x32xf32>
    %c0_42 = arith.constant 0 : index
    %c0_43 = arith.constant 0 : index
    %57 = vector.load %arg5[%c0_42, %c0_43] : memref<32x32xf32, #tpu.memory_space<vmem>>, vector<32x32xf32>
    %cst_44 = arith.constant dense<0.000000e+00> : vector<16x32xf32>
    %58 = tpu.matmul %56, %57, %cst_44 {dimension_numbers = #tpu.dot_dimension_numbers<[1], [0], [0], [1], [0, 0, 1, 1], [], []>} : vector<16x32xf32>, vector<32x32xf32>, vector<16x32xf32> -> vector<16x32xf32>
    %c0_45 = arith.constant 0 : index
    %c0_46 = arith.constant 0 : index
    %59 = vector.load %arg6[%c0_45, %c0_46] : memref<1x32xf32, #tpu.memory_space<vmem>>, vector<1x32xf32>
    %60 = vector.broadcast %59 : vector<1x32xf32> to vector<16x32xf32>
    %61 = arith.addf %58, %60 : vector<16x32xf32>
    %62 = arith.addf %1, %61 : vector<16x32xf32>
    %c0_47 = arith.constant 0 : index
    %c0_48 = arith.constant 0 : index
    %63 = vector.load %arg7[%c0_47, %c0_48] : memref<1x32xf32, #tpu.memory_space<vmem>>, vector<1x32xf32>
    %c0_49 = arith.constant 0 : index
    %c0_50 = arith.constant 0 : index
    %64 = vector.load %arg8[%c0_49, %c0_50] : memref<1x32xf32, #tpu.memory_space<vmem>>, vector<1x32xf32>
    %cst_51 = arith.constant dense<0.000000e+00> : vector<16xf32>
    %65 = vector.multi_reduction <add>, %62, %cst_51 [1] : vector<16x32xf32> to vector<16xf32>
    %66 = vector.shape_cast %65 : vector<16xf32> to vector<16x1xf32>
    %cst_52 = arith.constant 3.200000e+01 : f32
    %67 = vector.broadcast %cst_52 : f32 to vector<16x1xf32>
    %68 = arith.divf %66, %67 : vector<16x1xf32>
    %69 = vector.broadcast %68 : vector<16x1xf32> to vector<16x32xf32>
    %70 = arith.subf %62, %69 : vector<16x32xf32>
    %71 = arith.mulf %70, %70 : vector<16x32xf32>
    %cst_53 = arith.constant dense<0.000000e+00> : vector<16xf32>
    %72 = vector.multi_reduction <add>, %71, %cst_53 [1] : vector<16x32xf32> to vector<16xf32>
    %73 = vector.shape_cast %72 : vector<16xf32> to vector<16x1xf32>
    %cst_54 = arith.constant 3.200000e+01 : f32
    %74 = vector.broadcast %cst_54 : f32 to vector<16x1xf32>
    %75 = arith.divf %73, %74 : vector<16x1xf32>
    %76 = vector.broadcast %68 : vector<16x1xf32> to vector<16x32xf32>
    %77 = arith.subf %62, %76 : vector<16x32xf32>
    %cst_55 = arith.constant 9.99999974E-6 : f32
    %78 = vector.broadcast %cst_55 : f32 to vector<16x1xf32>
    %79 = arith.addf %75, %78 : vector<16x1xf32>
    %80 = math.rsqrt %79 : vector<16x1xf32>
    %81 = vector.broadcast %80 : vector<16x1xf32> to vector<16x32xf32>
    %82 = arith.mulf %77, %81 : vector<16x32xf32>
    %83 = vector.broadcast %63 : vector<1x32xf32> to vector<16x32xf32>
    %84 = arith.mulf %82, %83 : vector<16x32xf32>
    %85 = vector.broadcast %64 : vector<1x32xf32> to vector<16x32xf32>
    %86 = arith.addf %84, %85 : vector<16x32xf32>
    %c0_56 = arith.constant 0 : index
    %c0_57 = arith.constant 0 : index
    %87 = vector.load %arg9[%c0_56, %c0_57] : memref<32x64xf32, #tpu.memory_space<vmem>>, vector<32x64xf32>
    %cst_58 = arith.constant dense<0.000000e+00> : vector<16x64xf32>
    %88 = tpu.matmul %86, %87, %cst_58 {dimension_numbers = #tpu.dot_dimension_numbers<[1], [0], [0], [1], [0, 0, 1, 1], [], []>} : vector<16x32xf32>, vector<32x64xf32>, vector<16x64xf32> -> vector<16x64xf32>
    %c0_59 = arith.constant 0 : index
    %c0_60 = arith.constant 0 : index
    %89 = vector.load %arg10[%c0_59, %c0_60] : memref<1x64xf32, #tpu.memory_space<vmem>>, vector<1x64xf32>
    %90 = vector.broadcast %89 : vector<1x64xf32> to vector<16x64xf32>
    %91 = arith.addf %88, %90 : vector<16x64xf32>
    %cst_61 = arith.constant 0.000000e+00 : f32
    %92 = vector.broadcast %cst_61 : f32 to vector<16x64xf32>
    %93 = arith.maximumf %91, %92 : vector<16x64xf32>
    %c0_62 = arith.constant 0 : index
    %c0_63 = arith.constant 0 : index
    %94 = vector.load %arg11[%c0_62, %c0_63] : memref<64x32xf32, #tpu.memory_space<vmem>>, vector<64x32xf32>
    %cst_64 = arith.constant dense<0.000000e+00> : vector<16x32xf32>
    %95 = tpu.matmul %93, %94, %cst_64 {dimension_numbers = #tpu.dot_dimension_numbers<[1], [0], [0], [1], [0, 0, 1, 1], [], []>} : vector<16x64xf32>, vector<64x32xf32>, vector<16x32xf32> -> vector<16x32xf32>
    %c0_65 = arith.constant 0 : index
    %c0_66 = arith.constant 0 : index
    %96 = vector.load %arg12[%c0_65, %c0_66] : memref<1x32xf32, #tpu.memory_space<vmem>>, vector<1x32xf32>
    %97 = vector.broadcast %96 : vector<1x32xf32> to vector<16x32xf32>
    %98 = arith.addf %95, %97 : vector<16x32xf32>
    %99 = arith.addf %86, %98 : vector<16x32xf32>
    %c0_67 = arith.constant 0 : index
    %c0_68 = arith.constant 0 : index
    %100 = vector.load %arg13[%c0_67, %c0_68] : memref<1x32xf32, #tpu.memory_space<vmem>>, vector<1x32xf32>
    %c0_69 = arith.constant 0 : index
    %c0_70 = arith.constant 0 : index
    %101 = vector.load %arg14[%c0_69, %c0_70] : memref<1x32xf32, #tpu.memory_space<vmem>>, vector<1x32xf32>
    %cst_71 = arith.constant dense<0.000000e+00> : vector<16xf32>
    %102 = vector.multi_reduction <add>, %99, %cst_71 [1] : vector<16x32xf32> to vector<16xf32>
    %103 = vector.shape_cast %102 : vector<16xf32> to vector<16x1xf32>
    %cst_72 = arith.constant 3.200000e+01 : f32
    %104 = vector.broadcast %cst_72 : f32 to vector<16x1xf32>
    %105 = arith.divf %103, %104 : vector<16x1xf32>
    %106 = vector.broadcast %105 : vector<16x1xf32> to vector<16x32xf32>
    %107 = arith.subf %99, %106 : vector<16x32xf32>
    %108 = arith.mulf %107, %107 : vector<16x32xf32>
    %cst_73 = arith.constant dense<0.000000e+00> : vector<16xf32>
    %109 = vector.multi_reduction <add>, %108, %cst_73 [1] : vector<16x32xf32> to vector<16xf32>
    %110 = vector.shape_cast %109 : vector<16xf32> to vector<16x1xf32>
    %cst_74 = arith.constant 3.200000e+01 : f32
    %111 = vector.broadcast %cst_74 : f32 to vector<16x1xf32>
    %112 = arith.divf %110, %111 : vector<16x1xf32>
    %113 = vector.broadcast %105 : vector<16x1xf32> to vector<16x32xf32>
    %114 = arith.subf %99, %113 : vector<16x32xf32>
    %cst_75 = arith.constant 9.99999974E-6 : f32
    %115 = vector.broadcast %cst_75 : f32 to vector<16x1xf32>
    %116 = arith.addf %112, %115 : vector<16x1xf32>
    %117 = math.rsqrt %116 : vector<16x1xf32>
    %118 = vector.broadcast %117 : vector<16x1xf32> to vector<16x32xf32>
    %119 = arith.mulf %114, %118 : vector<16x32xf32>
    %120 = vector.broadcast %100 : vector<1x32xf32> to vector<16x32xf32>
    %121 = arith.mulf %119, %120 : vector<16x32xf32>
    %122 = vector.broadcast %101 : vector<1x32xf32> to vector<16x32xf32>
    %123 = arith.addf %121, %122 : vector<16x32xf32>
    %c0_76 = arith.constant 0 : index
    %c0_77 = arith.constant 0 : index
    %c0_78 = arith.constant 0 : index
    %124 = vector.load %arg15[%c0_76, %c0_77, %c0_78] : memref<1x16x32xf32, #tpu.memory_space<vmem>>, vector<1x16x32xf32>
    %125 = vector.shape_cast %124 : vector<1x16x32xf32> to vector<16x32xf32>
    %126 = vector.shape_cast %123 : vector<16x32xf32> to vector<1x16x32xf32>
    tpu.vector_store %arg15[%c0_76, %c0_77, %c0_78], %126 {strides = array<i32>} : memref<1x16x32xf32, #tpu.memory_space<vmem>>, vector<1x16x32xf32>,
    return
  }
  func.func @transform_0(%arg0: i32) -> (i32, i32, i32) {
    %c0_i32 = arith.constant 0 : i32
    %c0_i32_0 = arith.constant 0 : i32
    %c0_i32_1 = arith.constant 0 : i32
    return %arg0, %c0_i32, %c0_i32_0 : i32, i32, i32
  }
  func.func @transform_1(%arg0: i32) -> (i32, i32, i32) {
    %c0_i32 = arith.constant 0 : i32
    %c0_i32_0 = arith.constant 0 : i32
    %c0_i32_1 = arith.constant 0 : i32
    return %arg0, %c0_i32, %c0_i32_0 : i32, i32, i32
  }
  func.func @transform_2(%arg0: i32) -> (i32, i32) {
    %c0_i32 = arith.constant 0 : i32
    %c0_i32_0 = arith.constant 0 : i32
    %c0_i32_1 = arith.constant 0 : i32
    return %c0_i32, %c0_i32_0 : i32, i32
  }
  func.func @transform_3(%arg0: i32) -> (i32, i32) {
    %c0_i32 = arith.constant 0 : i32
    %c0_i32_0 = arith.constant 0 : i32
    %c0_i32_1 = arith.constant 0 : i32
    return %c0_i32, %c0_i32_0 : i32, i32
  }
  func.func @transform_4(%arg0: i32) -> (i32, i32) {
    %c0_i32 = arith.constant 0 : i32
    %c0_i32_0 = arith.constant 0 : i32
    %c0_i32_1 = arith.constant 0 : i32
    return %c0_i32, %c0_i32_0 : i32, i32
  }
  func.func @transform_5(%arg0: i32) -> (i32, i32) {
    %c0_i32 = arith.constant 0 : i32
    %c0_i32_0 = arith.constant 0 : i32
    %c0_i32_1 = arith.constant 0 : i32
    return %c0_i32, %c0_i32_0 : i32, i32
  }
  func.func @transform_6(%arg0: i32) -> (i32, i32) {
    %c0_i32 = arith.constant 0 : i32
    %c0_i32_0 = arith.constant 0 : i32
    %c0_i32_1 = arith.constant 0 : i32
    return %c0_i32, %c0_i32_0 : i32, i32
  }
  func.func @transform_7(%arg0: i32) -> (i32, i32) {
    %c0_i32 = arith.constant 0 : i32
    %c0_i32_0 = arith.constant 0 : i32
    %c0_i32_1 = arith.constant 0 : i32
    return %c0_i32, %c0_i32_0 : i32, i32
  }
  func.func @transform_8(%arg0: i32) -> (i32, i32) {
    %c0_i32 = arith.constant 0 : i32
    %c0_i32_0 = arith.constant 0 : i32
    %c0_i32_1 = arith.constant 0 : i32
    return %c0_i32, %c0_i32_0 : i32, i32
  }
  func.func @transform_9(%arg0: i32) -> (i32, i32) {
    %c0_i32 = arith.constant 0 : i32
    %c0_i32_0 = arith.constant 0 : i32
    %c0_i32_1 = arith.constant 0 : i32
    return %c0_i32, %c0_i32_0 : i32, i32
  }
  func.func @transform_10(%arg0: i32) -> (i32, i32) {
    %c0_i32 = arith.constant 0 : i32
    %c0_i32_0 = arith.constant 0 : i32
    %c0_i32_1 = arith.constant 0 : i32
    return %c0_i32, %c0_i32_0 : i32, i32
  }
  func.func @transform_11(%arg0: i32) -> (i32, i32) {
    %c0_i32 = arith.constant 0 : i32
    %c0_i32_0 = arith.constant 0 : i32
    %c0_i32_1 = arith.constant 0 : i32
    return %c0_i32, %c0_i32_0 : i32, i32
  }
  func.func @transform_12(%arg0: i32) -> (i32, i32) {
    %c0_i32 = arith.constant 0 : i32
    %c0_i32_0 = arith.constant 0 : i32
    %c0_i32_1 = arith.constant 0 : i32
    return %c0_i32, %c0_i32_0 : i32, i32
  }
  func.func @transform_13(%arg0: i32) -> (i32, i32) {
    %c0_i32 = arith.constant 0 : i32
    %c0_i32_0 = arith.constant 0 : i32
    %c0_i32_1 = arith.constant 0 : i32
    return %c0_i32, %c0_i32_0 : i32, i32
  }
  func.func @transform_14(%arg0: i32) -> (i32, i32, i32) {
    %c0_i32 = arith.constant 0 : i32
    %c0_i32_0 = arith.constant 0 : i32
    %c0_i32_1 = arith.constant 0 : i32
    return %arg0, %c0_i32, %c0_i32_0 : i32, i32, i32
  }
}

</mosaic_0001>

<bundles_post_ra>
// kernel: tpu_custom_call.1
= control target key start
LH: loop header
LB: loop body
LE: loop exit
PB: predicated region body
PF: predicated region fallthrough
CT: control target
= control target key end

     0   :  { %s3009_s0 = inlined_call_operand.vmem [shape: f32[2,16,32], index: 0, kind: input, shape index: {}]   ;;  %s3010_s1 = inlined_call_operand.vmem [shape: f32[2,1,16], index: 1, kind: input, shape index: {}]   ;;  %s3011_s2 = inlined_call_operand.vmem [shape: f32[32,96], index: 2, kind: input, shape index: {}]   ;;  %s3012_s3 = inlined_call_operand.vmem [shape: f32[1,96], index: 3, kind: input, shape index: {}]   ;;  %s3013_s4 = inlined_call_operand.vmem [shape: f32[32,32], index: 4, kind: input, shape index: {}]   ;;  %s3014_s5 = inlined_call_operand.vmem [shape: f32[1,32], index: 5, kind: input, shape index: {}]   ;;  %s3015_s6 = inlined_call_operand.vmem [shape: f32[1,32], index: 6, kind: input, shape index: {}]   ;;  %s3016_s7 = inlined_call_operand.hbm [shape: f32[1,32], index: 7, kind: input, shape index: {}]   ;;  %s3017_s8 = inlined_call_operand.hbm [shape: f32[32,64], index: 8, kind: input, shape index: {}]   ;;  %s3018_s9 = inlined_call_operand.hbm [shape: f32[1,64], index: 9, kind: input, shape index: {}]   ;;  %s3019_s10 = inlined_call_operand.vmem [shape: f32[64,32], index: 10, kind: input, shape index: {}]   ;;  %s3020_s11 = inlined_call_operand.vmem [shape: f32[1,32], index: 11, kind: input, shape index: {}]   ;;  %s3021_s12 = inlined_call_operand.vmem [shape: f32[1,32], index: 12, kind: input, shape index: {}]   ;;  %s3022_s13 = inlined_call_operand.vmem [shape: f32[1,32], index: 13, kind: input, shape index: {}]   ;;  %s3023_s14 = inlined_call_operand.hbm [shape: f32[2,16,32], index: 14, kind: output, shape index: {}]  }
   0x1   :  { %3036 = sst [smem:[#allocation23_spill]] %s3021_s12 }
   0x2   :  { %3037 = sst [smem:[#allocation24_spill]] %s3022_s13 }
   0x3   :  { %3038 = sst [smem:[#allocation25_spill]] %s3023_s14 }
   0x4   :  { %19 = vsyncpa [#allocation7], 0 }
   0x5   :  { %20 = vsyncpa [#allocation10], 0 }
   0x6   :  { %21 = vsyncpa [#allocation8], 0 }
   0x7   :  { %23 = vsyncpa [#allocation8 + $0x1], 0  ;;  %s2599_s29 = smov 0   ;;  %s2601_s30 = smov 0  }
   0x8   :  { %s2603_s15 = smov 0   ;;  %s2605_s16 = smov 0  }
   0x9 LB: > { %3039 = sst [smem:[#allocation16_spill]] %s2481_s29  ;;  %s2620_s17 = sadd.s32 4294967295, %s2493_s16   ;;  %s2493_s16 = sphi %s2605_s16, %s3067_s16   ;;  %s2489_s15 = sphi %s2603_s15, %s3069_s15   ;;  %s2485_s30 = sphi %s2601_s30, %s3071_s30   ;;  %s2481_s29 = sphi %s2599_s29, %s3070_s29  }
   0xa   : > { %3040 = sst [smem:[#allocation17_spill]] %s2489_s15  ;;  %s1930_s18 = sadd.s32 4294967294, %s2493_s16  }
   0xb   : > { %3041 = sst [smem:[#allocation18_spill]] %s2493_s16  ;;  %s2624_s19 = sadd.s32 1, %s2493_s16  }
   0xc   : > { %3042 = sst [smem:[#allocation19_spill]] %s2624_s19  ;;  %s340_s20 = sadd.s32 1, %s2489_s15 }
   0xd   : > { %s337_s21 = ssub.s32 %s2493_s16, %s2624_s19  ;;  %p350_p0 = scmp.ne.s32.totalorder %s2489_s15, %s2485_s30 }
   0xe   : > { %p338_p1 = scmp.eq.s32.totalorder %s337_s21, 0  ;;  %p351_p2 = scmp.eq.s32.totalorder %s2620_s17, 1 }
   0xf   : > { %p356_p3 = scmp.ne.s32.totalorder %s2485_s30, %s2481_s29  ;;  %p357_p4 = scmp.eq.s32.totalorder %s1930_s18, 1 }
  0x10   : > { %s2635_s22 = scalar_select %p338_p1, %s2489_s15, %s340_s20  }
  0x11   : > { %p2637_p5 = por %p351_p2, %p350_p0  ;;  %p2641_p6 = por %p357_p4, %p356_p3 }
  0x12   : > { %3043 = sst [smem:[#allocation20_spill]] %s2635_s22  ;;  %p1931_p7 = scmp.ge.s32.totalorder %s2493_s16, 1 }
  0x13   : > { %s3044_s23 = scalar_select %p2637_p5, 1, 0 }
  0x14   : > { %s3046_s24 = scalar_select %p2641_p6, 1, 0 }
  0x15   : > { %3045 = sst [smem:[#allocation21_spill]] %s3044_s23  ;;  %p364_p8 = scmp.lt.s32.totalorder %s2493_s16, 3 }
  0x16   : > { %3047 = sst [smem:[#allocation22_spill]] %s3046_s24  ;;  %p3030_p9 = scmp.eq.s32.totalorder %s2620_s17, 0 }
  0x17   : > { %p2648_p10 = pnand %p1931_p7, %p364_p8  ;;  %s2499_s26 = smov [#allocation9]  }
  0x18   : > { %s402_s27 = sshll.u32 %s2499_s26, 4  ;;  %s2500_s18 = smov [#allocation6]   ;;  %s2654_s27 = int_to_ptr.vmem [resolvable:$true] %s402_s27 }
  0x19   : > { %s3048_s25 = scalar_select %p2648_p10, 1, 0 }
  0x1a   : > { %p2226_p11 = pneg %p2648_p10  ;;  %s392_s20 = sshll.u32 %s2500_s18, 4  ;;  %s2662_s20 = int_to_ptr.vmem [resolvable:$true] %s392_s20 }
  0x1b   : > { %s2501_s21 = smov [#allocation11]   ;;  %s2335_s26 = scalar_lea.hbm %s3017_s8, 512 }
  0x1c   : > { %p2658_p12 = pnand %p3030_p9, %p2226_p11  ;;  %s2664_s22 = sshll.u32 %s2501_s21, 4  ;;  %s417_s22 = int_to_ptr.vmem [resolvable:$true] %s2664_s22 }
  0x1d   : > { %p2336_p13 = scmp.ne.s32.totalorder %s3017_s8, %s2335_s26  ;;  %p2342_p3 = scmp.lt.u32.totalorder %s2335_s26, %s3017_s8 }
  0x1e   : > { %p2674_p0 = pneg %p2658_p12 }
  0x20   : > { %p2338_p1 = pnand %p2674_p0, %p2336_p13 }
  0x22   : > { %p2339_p2 = pneg %p2338_p1 }
  0x24   : > { %p2344_p4 = pnand %p2342_p3, %p2339_p2 }
  0x26   : > { %2347 = shalt.err (!%p2344_p4)
}
  0x27   : > { %s2348_s29 = scalar_lea.vmem %s2654_s27, 512  ;;  %p2356_p9 = scmp.lt.s32.totalorder %s2654_s27, %s2654_s27 }
  0x28   : > { %p2349_p7 = scmp.ne.s32.totalorder %s2654_s27, %s2348_s29  ;;  %p2357_p6 = scmp.lt.s32.totalorder %s2348_s29, %s2348_s29 }
  0x2a   : > { %p2351_p8 = pnand %p2349_p7, %p2674_p0  ;;  %p2358_p13 = por %p2357_p6, %p2356_p9 }
  0x2c   : > { %p2352_p11 = pneg %p2351_p8 }
  0x2e   : > { %p2359_p1 = pnand %p2358_p13, %p2352_p11 }
  0x30   : > { %2362 = shalt.err (!%p2359_p1)
}
  0x31   : > { %s2502_s15 = smov 128   ;;  %s2503_s19 = smov 8  }
  0x32   : > { %2232 = dma.hbm_to_vmem [thread:$0]  (!%p2658_p12), %s3017_s8, 512, %s2654_s27, [#allocation10], %s2502_s15, %s2502_s15, %s2503_s19  }
  0x33   : > { %s2363_s14 = scalar_lea.hbm %s3016_s7, 16 }
  0x34   : > { %p2364_p6 = scmp.ne.s32.totalorder %s3016_s7, %s2363_s14  ;;  %p2370_p3 = scmp.lt.u32.totalorder %s2363_s14, %s3016_s7 }
  0x36   : > { %p2366_p9 = pnand %p2364_p6, %p2674_p0 }
  0x38   : > { %p2367_p2 = pneg %p2366_p9 }
  0x3a   : > { %p2372_p4 = pnand %p2370_p3, %p2367_p2 }
  0x3c   : > { %2375 = shalt.err (!%p2372_p4)
}
  0x3d   : > { %s2376_s27 = scalar_lea.vmem %s2662_s20, 16  ;;  %s2383_s13 = scalar_lea.vmem %s2662_s20, 32 }
  0x3e   : > { %p2377_p7 = scmp.ne.s32.totalorder %s2662_s20, %s2376_s27  ;;  %p2384_p13 = scmp.lt.s32.totalorder %s2662_s20, %s2662_s20 }
  0x3f   : > { %p2385_p1 = scmp.lt.s32.totalorder %s2383_s13, %s2376_s27 }
  0x40   : > { %p2379_p8 = pnand %p2377_p7, %p2674_p0 }
  0x41   : > { %p2386_p6 = por %p2385_p1, %p2384_p13 }
  0x42   : > { %p2380_p11 = pneg %p2379_p8 }
  0x44   : > { %p2387_p9 = pnand %p2386_p6, %p2380_p11 }
  0x46   : > { %2390 = shalt.err (!%p2387_p9)
}
  0x47   : > { %2229 = dma.hbm_to_vmem [thread:$0]  (!%p2658_p12), %s3016_s7, 16, %s2662_s20, [#allocation7]  }
  0x48   : > { %s2391_s19 = scalar_lea.hbm %s3018_s9, 16 }
  0x49   : > { %p2392_p2 = scmp.ne.s32.totalorder %s3018_s9, %s2391_s19  ;;  %p2398_p7 = scmp.lt.u32.totalorder %s2391_s19, %s3018_s9 }
  0x4b   : > { %p2394_p3 = pnand %p2392_p2, %p2674_p0 }
  0x4d   : > { %p2395_p4 = pneg %p2394_p3 }
  0x4f   : > { %p2400_p8 = pnand %p2398_p7, %p2395_p4 }
  0x51   : > { %2403 = shalt.err (!%p2400_p8)
}
  0x52   : > { %s2404_s29 = scalar_lea.vmem %s417_s22, 16  ;;  %s2411_s20 = scalar_lea.vmem %s417_s22, 32 }
  0x53   : > { %p2405_p11 = scmp.ne.s32.totalorder %s417_s22, %s2404_s29  ;;  %p2412_p6 = scmp.lt.s32.totalorder %s417_s22, %s417_s22 }
  0x54   : > { %p2413_p9 = scmp.lt.s32.totalorder %s2411_s20, %s2404_s29 }
  0x55   : > { %p2407_p13 = pnand %p2405_p11, %p2674_p0 }
  0x56   : > { %p2414_p5 = por %p2413_p9, %p2412_p6 }
  0x57   : > { %p2408_p1 = pneg %p2407_p13 }
  0x59   : > { %p2415_p10 = pnand %p2414_p5, %p2408_p1 }
  0x5b   : > { %2418 = shalt.err (!%p2415_p10)
}
  0x5c   : > { %2235 = dma.hbm_to_vmem [thread:$0]  (!%p2658_p12), %s3018_s9, 16, %s417_s22, [#allocation10]  }
  0x5d   : > { %p3051_p2 = scmp.ne.s32.totalorder %s3048_s25, 0 }
  0x5e   : > { %p3052_p3 = scmp.eq.s32.totalorder (!%p3051_p2), %s2620_s17, 0 }
  0x5f   : > { %455 = sbr.rel (%p3051_p2) target bundleno = 2518 (0x9d6), region = 76 }
  0x66   : > { %2468 = dma.done.wait (%p3052_p3), [#allocation7], 16   ;;  %p3053_p0 = pmov %p3052_p3 }
  0x68   : > { %2470 = vsyncadd (%p3053_p0), [#allocation7], 4294967280  ;;  %p3054_p4 = pmov %p3053_p0 }
  0x69   : > { %p3055_p5 = pmov %p3053_p0 }
  0x6a   : > { %2472 = dma.done.wait (%p3054_p4), [#allocation10], 528  }
  0x6b   : > { %2474 = vsyncadd (%p3055_p5), [#allocation10], 4294966768  ;;  %s509_s16 = sand.u32 1, %s2485_s30   ;;  %p512_p10 = scmp.lt.s32.totalorder %s2620_s17, 1  ;;  %vm533_vm0 = vcmask 261120   ;;  %v522_v0 = vld [vmem:[%s3011_s2] sm:$0xff] }
  0x6c   : > { %s2752_s22 = sshll.u32 %s509_s16, 4  ;;  %v523_v1 = vld [vmem:[%s3011_s2 + $0x8] sm:$0xff]  ;;  %v524_v2 = vld [vmem:[%s3011_s2 + $0x10] sm:$0xff]  ;;  %v525_v4 = vld [vmem:[%s3011_s2 + $0x18] sm:$0xff]  ;;  %vm615_vm1 = vcmask 64512   ;;  %s2504_s15 = smov 64  }
  0x6d   : > { %s2755_s25 = scalar_select %p512_p10, %s2620_s17, 1  ;;  %v2144_v3 = vpack.c.bf16 %v523_v1, %v522_v0  ;;  %v2148_v6 = vpack.c.bf16 %v525_v4, %v524_v2  ;;  %v1943_v8 = vld [vmem:[%s3012_s3] ss:$0 sm:$0xff] }
  0x6e   : > { %s2505_s19 = smov 96   ;;  %s2507_s26 = smov 88  }
  0x6f   : > { %s1982_s28 = sshll.u32 %s2755_s25, 4  ;;  %s519_s23 = scalar_lea.vmem %s3010_s1, %s2755_s25  ;;  %2145 = vmatprep.subr.bf16.mxu0 %v2144_v3 }
  0x70   : > { %s516_s24 = scalar_lea.vmem %s3009_s0, %s1982_s28  ;;  %2147 = vmatpush3.bf16.msra.mxu0 %v2144_v3  ;;  %s2508_s18 = smov 56  }
  0x71   : > { %v2777_v5 = vld [vmem:[%s516_s24] sm:$0xff]  ;;  %2149 = vmatprep.subr.bf16.mxu0 %v2148_v6  ;;  %v2781_v7 = vld [vmem:[%s516_s24 + $0x8] sm:$0xff]  ;;  %s2506_s24 = smov 120   ;;  %s2509_s21 = smov 112  }
  0x72   : > { %2044 = vmatprep.mubr.msk.f32.mxu0 %vm533_vm0, %v2777_v5  ;;  %s2510_s29 = smov 80   ;;  %s2511_s20 = smov 48  }
  0x73   : > { %s2512_s27 = smov 104   ;;  %s2513_s13 = smov 72  }
  0x74   : > { %2151 = vmatpush3.bf16.msra.mxu0 %v2148_v6  ;;  %s2514_s12 = smov 40   ;;  %s2813_s28 = scalar_lea.vmem [#allocation12], %s2752_s22 }
  0x75   : > { %s2815_s14 = smov 0  }
  0x77   : > { %2045 = vmatmul.mubr.msk.f32.vlgmr.msra.gmra.mrb[0].mxu0 %vm533_vm0, %v2781_v7 }
 0x14a   : > { %v2046_v9 = vpop.f32.mrb[0].mxu0 }
 0x14b   : > { %v612_v10 = vadd.f32 %v2046_v9, %v1943_v8  ;;  %v606_v11 = vpop.f32.mrb[1].mxu0 }
 0x14c   : > { %v607_v12 = vadd.f32 %v1943_v8, %v606_v11 }
 0x14d   : > { %617 = vst.msk [vmem:[#allocation2 + $0x8] sm:$0xff] %vm615_vm1, %v612_v10  ;;  %630 = vrot.lane.b32.xlu1 %v612_v10, %s2504_s15  ;;  %622 = vrot.lane.b32.xlu0 %v612_v10, %s2505_s19 }
 0x14e   : > { %616 = vst.msk [vmem:[#allocation2] sm:$0xff] %vm615_vm1, %v607_v12 }
 0x151   : > { %638 = vrot.lane.b32.xlu1 %v612_v10, %s2506_s24  ;;  %620 = vrot.lane.b32.xlu0 %v607_v12, %s2505_s19 }
 0x155   : > { %647 = vrot.lane.b32.xlu1 %v612_v10, %s2507_s26  ;;  %636 = vrot.lane.b32.xlu0 %v607_v12, %s2506_s24 }
 0x159   : > { %656 = vrot.lane.b32.xlu1 %v612_v10, %s2508_s18  ;;  %645 = vrot.lane.b32.xlu0 %v607_v12, %s2507_s26 }
 0x15d   : > { %665 = vrot.lane.b32.xlu1 %v612_v10, %s2509_s21  ;;  %654 = vrot.lane.b32.xlu0 %v607_v12, %s2508_s18 }
 0x161   : > { %674 = vrot.lane.b32.xlu1 %v612_v10, %s2510_s29  ;;  %663 = vrot.lane.b32.xlu0 %v607_v12, %s2509_s21 }
 0x165   : > { %683 = vrot.lane.b32.xlu1 %v612_v10, %s2511_s20  ;;  %672 = vrot.lane.b32.xlu0 %v607_v12, %s2510_s29 }
 0x169   : > { %692 = vrot.lane.b32.xlu1 %v612_v10, %s2512_s27  ;;  %681 = vrot.lane.b32.xlu0 %v607_v12, %s2511_s20 }
 0x16d   : > { %701 = vrot.lane.b32.xlu1 %v612_v10, %s2513_s13  ;;  %690 = vrot.lane.b32.xlu0 %v607_v12, %s2512_s27 }
 0x171   : > { %628 = vrot.lane.b32.xlu1 %v607_v12, %s2504_s15  ;;  %699 = vrot.lane.b32.xlu0 %v607_v12, %s2513_s13 }
 0x175   : > { %710 = vrot.lane.b32.xlu1 %v612_v10, %s2514_s12  ;;  %708 = vrot.lane.b32.xlu0 %v607_v12, %s2514_s12 }
 0x1bf   : > { %v631_v13 = vpop.permute.xlu1 %630  ;;  %v623_v14 = vpop.permute.xlu0 %622 }
 0x1c0   : > { %635 = vst.msk [vmem:[#allocation4 + $0x8] sm:$0xff] %vm615_vm1, %v631_v13  ;;  %627 = vst.msk [vmem:[#allocation3 + $0x8] sm:$0xff] %vm615_vm1, %v623_v14 }
 0x1c3   : > { %v639_v15 = vpop.permute.xlu1 %638  ;;  %v621_v16 = vpop.permute.xlu0 %620 }
 0x1c4   : > { %644 = vst.msk [vmem:[#allocation2 + $0x18] sm:$0xff] %vm615_vm1, %v639_v15  ;;  %626 = vst.msk [vmem:[#allocation3] sm:$0xff] %vm615_vm1, %v621_v16 }
 0x1c7   : > { %v648_v17 = vpop.permute.xlu1 %647  ;;  %v637_v18 = vpop.permute.xlu0 %636 }
 0x1c8   : > { %653 = vst.msk [vmem:[#allocation3 + $0x18] sm:$0xff] %vm615_vm1, %v648_v17  ;;  %643 = vst.msk [vmem:[#allocation2 + $0x10] sm:$0xff] %vm615_vm1, %v637_v18 }
 0x1cb   : > { %v657_v19 = vpop.permute.xlu1 %656  ;;  %v646_v20 = vpop.permute.xlu0 %645 }
 0x1cc   : > { %662 = vst.msk [vmem:[#allocation4 + $0x18] sm:$0xff] %vm615_vm1, %v657_v19  ;;  %652 = vst.msk [vmem:[#allocation3 + $0x10] sm:$0xff] %vm615_vm1, %v646_v20 }
 0x1cf   : > { %v666_v21 = vpop.permute.xlu1 %665  ;;  %v655_v22 = vpop.permute.xlu0 %654 }
 0x1d0   : > { %671 = vst.msk [vmem:[#allocation2 + $0x28] sm:$0xff] %vm615_vm1, %v666_v21  ;;  %661 = vst.msk [vmem:[#allocation4 + $0x10] sm:$0xff] %vm615_vm1, %v655_v22 }
 0x1d3   : > { %v675_v23 = vpop.permute.xlu1 %674  ;;  %v664_v24 = vpop.permute.xlu0 %663 }
 0x1d4   : > { %680 = vst.msk [vmem:[#allocation3 + $0x28] sm:$0xff] %vm615_vm1, %v675_v23  ;;  %670 = vst.msk [vmem:[#allocation2 + $0x20] sm:$0xff] %vm615_vm1, %v664_v24 }
 0x1d7   : > { %v684_v25 = vpop.permute.xlu1 %683  ;;  %v673_v26 = vpop.permute.xlu0 %672 }
 0x1d8   : > { %689 = vst.msk [vmem:[#allocation4 + $0x28] sm:$0xff] %vm615_vm1, %v684_v25  ;;  %679 = vst.msk [vmem:[#allocation3 + $0x20] sm:$0xff] %vm615_vm1, %v673_v26 }
 0x1db   : > { %v693_v27 = vpop.permute.xlu1 %692  ;;  %v682_v28 = vpop.permute.xlu0 %681 }
 0x1dc   : > { %698 = vst.msk [vmem:[#allocation2 + $0x38] sm:$0xff] %vm615_vm1, %v693_v27  ;;  %688 = vst.msk [vmem:[#allocation4 + $0x20] sm:$0xff] %vm615_vm1, %v682_v28 }
 0x1df   : > { %v702_v29 = vpop.permute.xlu1 %701  ;;  %v691_v30 = vpop.permute.xlu0 %690 }
 0x1e0   : > { %707 = vst.msk [vmem:[#allocation3 + $0x38] sm:$0xff] %vm615_vm1, %v702_v29  ;;  %697 = vst.msk [vmem:[#allocation2 + $0x30] sm:$0xff] %vm615_vm1, %v691_v30 }
 0x1e3   : > { %v629_v31 = vpop.permute.xlu1 %628  ;;  %v700_v32 = vpop.permute.xlu0 %699 }
 0x1e4   : > { %634 = vst.msk [vmem:[#allocation4] sm:$0xff] %vm615_vm1, %v629_v31  ;;  %706 = vst.msk [vmem:[#allocation3 + $0x30] sm:$0xff] %vm615_vm1, %v700_v32 }
 0x1e7   : > { %v711_v33 = vpop.permute.xlu1 %710  ;;  %v709_v34 = vpop.permute.xlu0 %708 }
 0x1e8   : > { %716 = vst.msk [vmem:[#allocation4 + $0x38] sm:$0xff] %vm615_vm1, %v711_v33  ;;  %715 = vst.msk [vmem:[#allocation4 + $0x30] sm:$0xff] %vm615_vm1, %v709_v34 }
 0x1e9 LB: >> { %v729_v35 = vld [vmem:[#allocation3] sm:$0xff]  ;;  %v730_v36 = vld [vmem:[#allocation3 + $0x8] sm:$0xff]  ;;  %vm2822_vm2 = vmpackc.low %vm615_vm1, %vm615_vm1  ;;  %v2515_v38 = vmov 0.0|0.0   ;;  %vm2516_vm3 = vmmov 0   ;;  %v2517_v43 = vmov 0.0   ;;  %s1946_s22 = sshll.u32 %s2497_s14, 3  ;;  %s2497_s14 = sphi %s2815_s14, %s722_s14  }
 0x1ea   : >> { %2152 = vmatprep.subr.bf16.mxu0 %v2515_v38  ;;  %v2153_v39 = vpack.c.bf16 %v730_v36, %v729_v35  ;;  %2156 = vmatprep.subr.bf16.mxu1 %v2515_v38  ;;  %v731_v40 = vld [vmem:[#allocation3 + $0x10] sm:$0xff]  ;;  %v732_v41 = vld [vmem:[#allocation3 + $0x18] sm:$0xff]  ;;  %v733_v44 = vld [vmem:[#allocation3 + $0x20] sm:$0xff]  ;;  %s724_s15 = scalar_lea.vmem [#allocation2], %s1946_s22  ;;  %vm1060_vm4 = vcmask 130048   ;;  %s1405_s26 = scalar_lea.vmem [#allocation5], %s1946_s22 }
 0x1eb   : >> { %v2157_v42 = vpack.c.bf16 %v732_v41, %v731_v40  ;;  %2051 = vmatprep.mubr.msk.f32.mxu0 %vm2516_vm3, %v2517_v43  ;;  %2058 = vmatprep.mubr.msk.f32.mxu1 %vm2516_vm3, %v2517_v43  ;;  %v734_v45 = vld [vmem:[#allocation3 + $0x28] sm:$0xff]  ;;  %v735_v46 = vld [vmem:[#allocation3 + $0x30] sm:$0xff]  ;;  %v736_v47 = vld [vmem:[#allocation3 + $0x38] sm:$0xff]  ;;  %s2518_s18 = smov 8   ;;  %s2519_s21 = smov 16   ;;  %vm1411_vm5 = vcmask 130112  }
 0x1ec   : >> { %2155 = vmatpush3.bf16.xpose.msk.msra.mxu0 %vm2822_vm2, %v2153_v39  ;;  %v725_v48 = vld [vmem:[%s724_s15] sm:$0xff]  ;;  %v2161_v49 = vpack.c.bf16 %v734_v45, %v733_v44  ;;  %v726_v50 = vld [vmem:[%s724_s15 + $0x10] sm:$0xff]  ;;  %v2165_v51 = vpack.c.bf16 %v736_v47, %v735_v46  ;;  %v1098_v10 = vld [vmem:[#allocation4 + $0x8] sm:$0xff]  ;;  %s2520_s29 = smov 24   ;;  %vm1417_vm6 = vcmask 195712   ;;  %vm1423_vm7 = vcmask 261312  }
 0x1ed   : >> { %2159 = vmatpush3.bf16.xpose.msk.msra.mxu1 %vm2822_vm2, %v2157_v42  ;;  %2160 = vmatprep.subr.bf16.mxu0 %v2515_v38  ;;  %v727_v52 = vld [vmem:[%s724_s15 + $0x20] sm:$0xff]  ;;  %v728_v53 = vld [vmem:[%s724_s15 + $0x30] sm:$0xff]  ;;  %v1100_v13 = vld [vmem:[#allocation4 + $0x18] sm:$0xff]  ;;  %s722_s14 = sadd.s32 1, %s2497_s14  }
 0x1ee   : >> { %2164 = vmatprep.subr.bf16.mxu1 %v2515_v38  ;;  %v1947_v54 = vld [vmem:[%s519_s23] ss:$0 sm:$0xff]  ;;  %v1099_v12 = vld [vmem:[#allocation4 + $0x10] sm:$0xff]  ;;  %v1102_v24 = vld [vmem:[#allocation4 + $0x28] sm:$0xff]  ;;  %p719_p12 = scmp.ge.s32.totalorder %s722_s14, 2  }
 0x1ef   : >> { %v1097_v9 = vld [vmem:[#allocation4] sm:$0xff]  ;;  %v2172_v14 = vpack.c.bf16 %v1100_v13, %v1099_v12  ;;  %v1103_v29 = vld [vmem:[#allocation4 + $0x30] sm:$0xff]  ;;  %v1104_v30 = vld [vmem:[#allocation4 + $0x38] sm:$0xff]  ;;  %vm1675_vm8 = vcmask (%p719_p12), 523264   ;;  %s3058_s13 = sld [smem:[#allocation23_spill]] (%p719_p12)  ;;  %s3060_s19 = sld [smem:[#allocation24_spill]] (%p719_p12) }
 0x1f0   : >> { %v2169_v11 = vpack.c.bf16 %v1098_v10, %v1097_v9  ;;  %v1101_v23 = vld [vmem:[#allocation4 + $0x20] sm:$0xff]  ;;  %v2178_v33 = vpack.c.bf16 %v1104_v30, %v1103_v29  ;;  %s3059_s12 = sld [smem:[#allocation21_spill]] (%p719_p12)  ;;  %s1983_s24 = sshll.u32 (%p719_p12), %s2620_s17, 8 }
 0x1f1   : >> { %v2175_v28 = vpack.c.bf16 %v1102_v24, %v1101_v23  ;;  %v1964_v10 = vld [vmem:[%s3014_s5] ss:$0 sm:$0xff] (%p719_p12)  ;;  %v1568_v29 = vld [vmem:[#allocation9 + $0x10] sm:$0xff] (%p719_p12)  ;;  %s1819_s25 = sshll.u32 (%p719_p12), %s2813_s28, 4  ;;  %s2968_s17 = scalar_lea.sflag (%p719_p12), [#allocation8], %s509_s16  ;;  %s2960_s25 = int_to_ptr.vmem [resolvable:$true] %s1819_s25 }
 0x1f3   : >> { %2052 = vmatmul.mubr.msk.f32.vlgmr.msra.gmra.mrb[0].mxu0 %vm615_vm1, %v725_v48 }
 0x1f4   : >> { %2163 = vmatpush3.bf16.xpose.msk.msra.mxu0 %vm2822_vm2, %v2161_v49  ;;  %2059 = vmatmul.mubr.msk.f32.vlgmr.msra.gmra.mrb[0].mxu1 %vm615_vm1, %v726_v50 }
 0x1f5   : >> { %2167 = vmatpush3.bf16.xpose.msk.msra.mxu1 %vm2822_vm2, %v2165_v51  ;;  %2065 = vmatprep.mubr.msk.f32.mxu0 %vm2516_vm3, %v2517_v43 }
 0x1f6   : >> { %2072 = vmatprep.mubr.msk.f32.mxu1 %vm2516_vm3, %v2517_v43  ;;  %2168 = vmatprep.subr.bf16.mxu0 %v2515_v38  ;;  %p3062_p8 = scmp.ne.s32.totalorder (%p719_p12), %s3059_s12, 0 }
 0x1f7   : >> { %2171 = vmatprep.subr.bf16.mxu1 %v2515_v38 }
 0x1fb   : >> { %2066 = vmatmul.mubr.msk.f32.vlgmr.msra.gmra.mrb[2].mxu0 %vm615_vm1, %v727_v52 }
 0x1fc   : >> { %2073 = vmatmul.mubr.msk.f32.vlgmr.msra.gmra.mrb[2].mxu1 %vm615_vm1, %v728_v53  ;;  %2079 = vmatprep.mubr.msk.f32.mxu0 %vm2516_vm3, %v2517_v43 }
 0x1fd   : >> { %2086 = vmatprep.mubr.msk.f32.mxu1 %vm2516_vm3, %v2517_v43  ;;  %2170 = vmatpush3.bf16.msra.mxu0 %v2169_v11 }
 0x1fe   : >> { %2174 = vmatprep.subr.bf16.mxu0 %v2515_v38  ;;  %2173 = vmatpush3.bf16.msra.mxu1 %v2172_v14 }
 0x1ff   : >> { %2177 = vmatprep.subr.bf16.mxu1 %v2515_v38 }
 0x2c6   : >> { %v819_v55 = vpop.f32.mrb[0].mxu0 }
 0x2c7   : >> { %v820_v56 = vadd.f32 %v1947_v54, %v819_v55  ;;  %v2053_v57 = vpop.f32.mrb[1].mxu0  ;;  %v898_v58 = vpop.f32.mrb[0].mxu1 }
 0x2c8   : >> { %v899_v59 = vadd.f32 %v1947_v54, %v898_v58  ;;  %v2060_v60 = vpop.f32.mrb[1].mxu1 }
 0x2c9   : >> { %v1061_v61 = vsel %vm1060_vm4, %v820_v56, -inf }
 0x2ca   : >> { %1062 = vmax.xlane.f32.xlu0 %v1061_v61  ;;  %v1064_v62 = vsel %vm1060_vm4, %v899_v59, -inf }
 0x2ce   : >> { %1065 = vmax.xlane.f32.xlu0 %v1064_v62  ;;  %v977_v63 = vpop.f32.mrb[2].mxu0 }
 0x2cf   : >> { %v978_v0 = vadd.f32 %v1947_v54, %v977_v63  ;;  %v2067_v1 = vpop.f32.mrb[3].mxu0  ;;  %v1056_v2 = vpop.f32.mrb[2].mxu1 }
 0x2d0   : >> { %v1057_v3 = vadd.f32 %v1947_v54, %v1056_v2  ;;  %v2074_v4 = vpop.f32.mrb[3].mxu1  ;;  %v1428_v1 = vld [vmem:[%s3013_s4 + $0x8] sm:$0xff] (%p719_p12)  ;;  %v1429_v2 = vld [vmem:[%s3013_s4 + $0x10] sm:$0xff] (%p719_p12) }
 0x2d1   : >> { %v1067_v6 = vsel %vm1060_vm4, %v978_v0, -inf  ;;  %v1430_v4 = vld [vmem:[%s3013_s4 + $0x18] sm:$0xff] (%p719_p12) }
 0x2d2   : >> { %1068 = vmax.xlane.f32.xlu1 %v1067_v6  ;;  %v1070_v8 = vsel %vm1060_vm4, %v1057_v3, -inf }
 0x2d6   : >> { %1071 = vmax.xlane.f32.xlu1 %v1070_v8  ;;  %v2184_v8 = vpack.c.bf16 (%p719_p12), %v1430_v4, %v1429_v2  ;;  %v1972_v4 = vld [vmem:[%s3020_s11] ss:$0 sm:$0xff] (%p719_p12) }
 0x357   : >> { %v1063_v15 = vpop.xlane.xlu0 %1062 }
 0x358   : >> { %v1073_v16 = vsub.f32 %v820_v56, %v1063_v15 }
 0x35a   : >> { %v1077_v17 = vmul.f32 1.442695, %v1073_v16 }
 0x35b   : >> { %v1066_v18 = vpop.xlane.xlu0 %1065 }
 0x35c   : >> { %2311 = vpow2.f32 %v1077_v17  ;;  %v1074_v19 = vsub.f32 %v899_v59, %v1066_v18 }
 0x35e   : >> { %v1079_v20 = vmul.f32 1.442695, %v1074_v19 }
 0x35f   : >> { %v1069_v21 = vpop.xlane.xlu1 %1068 }
 0x360   : >> { %2313 = vpow2.f32 %v1079_v20  ;;  %v1075_v22 = vsub.f32 %v978_v0, %v1069_v21  ;;  %v1427_v0 = vld [vmem:[%s3013_s4] sm:$0xff] (%p719_p12) }
 0x362   : >> { %v1081_v25 = vmul.f32 1.442695, %v1075_v22 }
 0x363   : >> { %v1072_v26 = vpop.xlane.xlu1 %1071 }
 0x364   : >> { %2315 = vpow2.f32 %v1081_v25  ;;  %v1076_v27 = vsub.f32 %v1057_v3, %v1072_v26  ;;  %v2180_v3 = vpack.c.bf16 (%p719_p12), %v1428_v1, %v1427_v0 }
 0x366   : >> { %v2312_v31 = vpop.eup %2311  ;;  %v1083_v32 = vmul.f32 1.442695, %v1076_v27 }
 0x367   : >> { %2080 = vmatmul.mubr.msk.f32.vlgmr.msra.gmra.mrb[4].mxu0 %vm1060_vm4, %v2312_v31  ;;  %v1085_v39 = vsel %vm1060_vm4, %v2312_v31, 0.0  ;;  %v1569_v31 = vld [vmem:[#allocation9 + $0x18] sm:$0xff] (%p719_p12) }
 0x368   : >> { %2317 = vpow2.f32 %v1083_v32  ;;  %2176 = vmatpush3.bf16.msra.mxu0 %v2175_v28  ;;  %2093 = vmatprep.mubr.msk.f32.mxu0 %vm2516_vm3, %v2517_v43  ;;  %v1567_v28 = vld [vmem:[#allocation9 + $0x8] sm:$0xff] (%p719_p12)  ;;  %v2192_v32 = vpack.c.bf16 (%p719_p12), %v1569_v31, %v1568_v29 }
 0x36a   : >> { %v2314_v34 = vpop.eup %2313 }
 0x36b   : >> { %2087 = vmatmul.mubr.msk.f32.vlgmr.msra.gmra.mrb[4].mxu1 %vm1060_vm4, %v2314_v34  ;;  %v1088_v35 = vsel %vm1060_vm4, %v2314_v34, 0.0  ;;  %v1661_v34 = vld [vmem:[%s3019_s10 + $0x8] sm:$0xff] (%p719_p12) }
 0x36c   : >> { %1089 = vadd.xlane.f32.xlu0 %v1088_v35  ;;  %2179 = vmatpush3.bf16.msra.mxu1 %v2178_v33  ;;  %v1660_v33 = vld [vmem:[%s3019_s10] sm:$0xff] (%p719_p12)  ;;  %v1662_v35 = vld [vmem:[%s3019_s10 + $0x10] sm:$0xff] (%p719_p12) }
 0x36d   : >> { %2100 = vmatprep.mubr.msk.f32.mxu1 %vm2516_vm3, %v2517_v43  ;;  %2181 = vmatprep.subr.bf16.mxu1 (%p719_p12), %v2180_v3 }
 0x36e   : >> { %v2316_v36 = vpop.eup %2315 }
 0x36f   : >> { %2094 = vmatmul.mubr.msk.f32.vlgmr.msra.gmra.mrb[6].mxu0 %vm1060_vm4, %v2316_v36  ;;  %v1091_v37 = vsel %vm1060_vm4, %v2316_v36, 0.0  ;;  %v2196_v36 = vpack.c.bf16 (%p719_p12), %v1661_v34, %v1660_v33  ;;  %v1976_v34 = vld [vmem:[%s3060_s19] ss:$0 sm:$0xff] (%p719_p12) }
 0x370   : >> { %1092 = vadd.xlane.f32.xlu1 %v1091_v37  ;;  %v1663_v37 = vld [vmem:[%s3019_s10 + $0x18] sm:$0xff] (%p719_p12) }
 0x371   : > { %2197 = vmatprep.subr.bf16.mxu0 (%p719_p12), %v2196_v36 }
 0x372   : >> { %v2318_v38 = vpop.eup %2317  ;;  %2199 = vmatpush3.bf16.msra.mxu0 (%p719_p12), %v2196_v36 }
 0x373   : >> { %2101 = vmatmul.mubr.msk.f32.vlgmr.msra.gmra.mrb[6].mxu1 %vm1060_vm4, %v2318_v38  ;;  %v1094_v40 = vsel %vm1060_vm4, %v2318_v38, 0.0  ;;  %v2200_v38 = vpack.c.bf16 (%p719_p12), %v1663_v37, %v1662_v35 }
 0x374   : >> { %1086 = vadd.xlane.f32.xlu1 %v1085_v39  ;;  %1095 = vadd.xlane.f32.xlu0 %v1094_v40  ;;  %v1664_v39 = vld [vmem:[%s3019_s10 + $0x20] sm:$0xff] (%p719_p12)  ;;  %v1665_v40 = vld [vmem:[%s3019_s10 + $0x28] sm:$0xff] (%p719_p12) }
 0x375   : > { %2183 = vmatpush3.bf16.msra.mxu1 (%p719_p12), %v2180_v3  ;;  %2201 = vmatprep.subr.bf16.mxu0 (%p719_p12), %v2200_v38 }
 0x376   : > { %2185 = vmatprep.subr.bf16.mxu1 (%p719_p12), %v2184_v8  ;;  %2203 = vmatpush3.bf16.msra.mxu0 (%p719_p12), %v2200_v38 }
 0x379   : > { %2187 = vmatpush3.bf16.msra.mxu1 (%p719_p12), %v2184_v8 }
 0x3f9   : >> { %v1090_v43 = vpop.xlane.xlu0 %1089 }
 0x3fd   : >> { %v1093_v41 = vpop.xlane.xlu1 %1092 }
 0x401   : >> { %v1087_v42 = vpop.xlane.xlu1 %1086  ;;  %v1096_v44 = vpop.xlane.xlu0 %1095 }
 0x402   : >> { %2319 = vrcp.f32 %v1087_v42 }
 0x403   : >> { %2321 = vrcp.f32 %v1090_v43 }
 0x404   : >> { %2323 = vrcp.f32 %v1093_v41  ;;  %v2204_v41 = vpack.c.bf16 (%p719_p12), %v1665_v40, %v1664_v39 }
 0x405   : >> { %2325 = vrcp.f32 %v1096_v44 }
 0x406   : > { %2205 = vmatprep.subr.bf16.mxu0 (%p719_p12), %v2204_v41 }
 0x407   : > { %2207 = vmatpush3.bf16.msra.mxu0 (%p719_p12), %v2204_v41 }
 0x40c   : >> { %v2320_v45 = vpop.eup %2319 }
 0x40d   : >> { %v2322_v49 = vpop.eup %2321 }
 0x40e   : >> { %v2324_v53 = vpop.eup %2323 }
 0x40f   : >> { %v2326_v57 = vpop.eup %2325 }
 0x43a   : >> { %v1174_v46 = vpop.f32.mrb[4].mxu0 }
 0x43b   : >> { %v1401_v47 = vmul.f32 %v2320_v45, %v1174_v46  ;;  %v2081_v48 = vpop.f32.mrb[5].mxu0 }
 0x43d   : >> { %1406 = vst.msk [vmem:[%s1405_s26] sm:$0xff] %vm615_vm1, %v1401_v47 }
 0x43e   : >> { %v1247_v50 = vpop.f32.mrb[4].mxu1 }
 0x43f   : >> { %v1402_v51 = vmul.f32 %v2322_v49, %v1247_v50  ;;  %v2088_v52 = vpop.f32.mrb[5].mxu1  ;;  %v1967_v49 = vld [vmem:[%s3015_s6] ss:$0 sm:$0xff] (%p719_p12) }
 0x441   : >> { %1408 = vrot.lane.b32.xlu0 %v1402_v51, %s2518_s18  ;;  %v1968_v51 = vld [vmem:[#allocation6] ss:$0 sm:$0xff] (%p719_p12) }
 0x442   : >> { %v1320_v54 = vpop.f32.mrb[6].mxu0 }
 0x443   : >> { %v1403_v55 = vmul.f32 %v2324_v53, %v1320_v54  ;;  %v2095_v56 = vpop.f32.mrb[7].mxu0 }
 0x445   : >> { %1414 = vrot.lane.b32.xlu1 %v1403_v55, %s2519_s21  ;;  %s2419_s21 = scalar_lea.vmem (%p719_p12), %s2960_s25, 256 }
 0x446   : >> { %v1393_v58 = vpop.f32.mrb[6].mxu1  ;;  %p2420_p7 = scmp.ne.s32.totalorder (%p719_p12), %s2960_s25, %s2419_s21 }
 0x447   : >> { %v1404_v59 = vmul.f32 %v2326_v57, %v1393_v58  ;;  %v2102_v60 = vpop.f32.mrb[7].mxu1  ;;  %v1666_v58 = vld [vmem:[%s3019_s10 + $0x30] sm:$0xff] (%p719_p12) }
 0x448   : > { %p2421_p11 = pnand (%p719_p12), %p2420_p7, %p3062_p8 }
 0x449   : >> { %1420 = vrot.lane.b32.xlu1 %v1404_v59, %s2520_s29  ;;  %v1667_v59 = vld [vmem:[%s3019_s10 + $0x38] sm:$0xff] (%p719_p12)  ;;  %s2521_s29 = smov (%p719_p12), [#allocation12]  }
 0x44a   : > { %v2208_v60 = vpack.c.bf16 (%p719_p12), %v1667_v59, %v1666_v58  ;;  %p2422_p13 = pneg (%p719_p12), %p2421_p11  ;;  %s2423_s20 = sshll.u32 (%p719_p12), %s2521_s29, 4  ;;  %s2424_s20 = int_to_ptr.vmem [resolvable:$false] %s2423_s20 }
 0x44b   : > { %s2425_s27 = scalar_lea.vmem (%p719_p12), %s2424_s20, 512  ;;  %p2426_p1 = scmp.lt.s32.totalorder (%p719_p12), %s2960_s25, %s2424_s20 }
 0x44c   : > { %2209 = vmatprep.subr.bf16.mxu0 (%p719_p12), %v2208_v60  ;;  %p2427_p6 = scmp.lt.s32.totalorder (%p719_p12), %s2425_s27, %s2419_s21 }
 0x44d   : > { %2211 = vmatpush3.bf16.msra.mxu0 (%p719_p12), %v2208_v60 }
 0x44e   : > { %p2428_p9 = por (%p719_p12), %p2427_p6, %p2426_p1 }
 0x450   : > { %p2429_p2 = pnand (%p719_p12), %p2428_p9, %p2422_p13 }
 0x4b3   : >> { %v1409_v61 = vpop.permute.xlu0 %1408 }
 0x4b4   : >> { %1412 = vst.msk [vmem:[%s1405_s26] sm:$0xff] %vm1411_vm5, %v1409_v61  ;;  %v1969_v61 = vld [vmem:[#allocation11] ss:$0 sm:$0xff] (%p719_p12) }
 0x4b6   : > { %721 = sbr.rel (!%p719_p12) target bundleno = 489 (0x1e9), region = 145 }
 0x4b7   : >> { %v1415_v62 = vpop.permute.xlu1 %1414 }
 0x4b8   : >> { %1418 = vst.msk [vmem:[%s1405_s26] sm:$0xff] %vm1417_vm6, %v1415_v62 }
 0x4bb   : >> { %v1421_v63 = vpop.permute.xlu1 %1420 }
 0x4bc   : >> { %1424 = vst.msk [vmem:[%s1405_s26] sm:$0xff] %vm1423_vm7, %v1421_v63  ;;  %s3061_s26 = sld [smem:[#allocation25_spill]] (%p719_p12) }
 0x4c2   : > { %s2958_s18 = scalar_lea.hbm %s3061_s26, %s1983_s24 }
 0x4c3   : > { %v1425_v6 = vld [vmem:[#allocation5] sm:$0xff]  ;;  %v1426_v9 = vld [vmem:[#allocation5 + $0x8] sm:$0xff] }
 0x4c4   : > { %2111 = vmatprep.mubr.msk.f32.mxu1 %vm533_vm0, %v1425_v6 }
 0x4c5   : > { %2112 = vmatmul.mubr.msk.f32.vlgmr.msra.gmra.mrb[0].mxu1 %vm533_vm0, %v1426_v9 }
 0x598   : > { %v2113_v11 = vpop.f32.mrb[0].mxu1 }
 0x599   : > { %v1510_v12 = vpop.f32.mrb[1].mxu1  ;;  %v1516_v13 = vadd.f32 %v2113_v11, %v1964_v10 }
 0x59a   : > { %v1511_v14 = vadd.f32 %v1964_v10, %v1510_v12 }
 0x59b   : > { %v1520_v16 = vadd.f32 %v1516_v13, %v2781_v7  ;;  %v1566_v7 = vld [vmem:[#allocation9] sm:$0xff] }
 0x59c   : > { %v1519_v15 = vadd.f32 %v1511_v14, %v2777_v5  ;;  %v2188_v30 = vpack.c.bf16 %v1567_v28, %v1566_v7 }
 0x59d   : > { %v1526_v18 = vsel %vm533_vm0, %v1520_v16, 0.0 }
 0x59e   : > { %v1523_v17 = vsel %vm533_vm0, %v1519_v15, 0.0  ;;  %2189 = vmatprep.subr.bf16.mxu1 %v2188_v30 }
 0x59f   : > { %1524 = vadd.xlane.f32.xlu0 %v1523_v17  ;;  %2191 = vmatpush3.bf16.msra.mxu1 %v2188_v30  ;;  %v1975_v30 = vld [vmem:[%s3058_s13] ss:$0 sm:$0xff] }
 0x5a0   : > { %2193 = vmatprep.subr.bf16.mxu1 %v2192_v32 }
 0x5a3   : > { %1527 = vadd.xlane.f32.xlu0 %v1526_v18  ;;  %2195 = vmatpush3.bf16.msra.mxu1 %v2192_v32 }
 0x62c   : > { %v1525_v19 = vpop.xlane.xlu0 %1524 }
 0x62d   : > { %v1530_v20 = vmul.f32 0.03125, %v1525_v19 }
 0x62f   : > { %v1532_v21 = vsub.f32 %v1519_v15, %v1530_v20 }
 0x630   : > { %v1528_v22 = vpop.xlane.xlu0 %1527 }
 0x631   : > { %v1531_v23 = vmul.f32 0.03125, %v1528_v22  ;;  %v1534_v24 = vmul.f32 %v1532_v21, %v1532_v21 }
 0x633   : > { %v1533_v25 = vsub.f32 %v1520_v16, %v1531_v23  ;;  %v1536_v26 = vsel %vm533_vm0, %v1534_v24, 0.0 }
 0x634   : > { %1537 = vadd.xlane.f32.xlu1 %v1536_v26 }
 0x635   : > { %v1535_v27 = vmul.f32 %v1533_v25, %v1533_v25 }
 0x637   : > { %v1539_v5 = vsel %vm533_vm0, %v1535_v27, 0.0 }
 0x638   : > { %1540 = vadd.xlane.f32.xlu1 %v1539_v5 }
 0x6c1   : > { %v1538_v42 = vpop.xlane.xlu1 %1537 }
 0x6c2   : > { %v1542_v43 = vmul.f32 0.03125, %v1538_v42 }
 0x6c4   : > { %v1544_v44 = vadd.f32 1e-05, %v1542_v43 }
 0x6c5   : > { %v1541_v45 = vpop.xlane.xlu1 %1540 }
 0x6c6   : > { %2327 = vrsqrt.f32 %v1544_v44  ;;  %v1543_v46 = vmul.f32 0.03125, %v1541_v45 }
 0x6c8   : > { %v1545_v47 = vadd.f32 1e-05, %v1543_v46 }
 0x6ca   : > { %2329 = vrsqrt.f32 %v1545_v47 }
 0x6d0   : > { %v2328_v48 = vpop.eup %2327 }
 0x6d1   : > { %v1548_v50 = vmul.f32 %v2328_v48, %v1532_v21 }
 0x6d3   : > { %v1556_v52 = vmul.f32 %v1967_v49, %v1548_v50 }
 0x6d4   : > { %v2330_v53 = vpop.eup %2329 }
 0x6d5   : > { %v1549_v54 = vmul.f32 %v2330_v53, %v1533_v25  ;;  %v1564_v55 = vadd.f32 %v1968_v51, %v1556_v52 }
 0x6d7   : > { %v1557_v56 = vmul.f32 %v1967_v49, %v1549_v54  ;;  %2122 = vmatprep.mubr.msk.f32.mxu1 %vm533_vm0, %v1564_v55 }
 0x6d9   : > { %v1565_v57 = vadd.f32 %v1968_v51, %v1557_v56 }
 0x6db   : > { %2123 = vmatmul.mubr.msk.f32.vlgmr.msra.gmra.mrb[2].mxu1 %vm533_vm0, %v1565_v57 }
 0x7ae   : > { %v2124_v62 = vpop.f32.mrb[2].mxu1 }
 0x7af   : > { %v1655_v63 = vadd.f32 %v2124_v62, %v1969_v61  ;;  %v1649_v0 = vpop.f32.mrb[3].mxu1 }
 0x7b0   : > { %v1650_v1 = vadd.f32 %v1969_v61, %v1649_v0 }
 0x7b1   : > { %v1659_v3 = vmax.f32 %v1655_v63, 0.0 }
 0x7b2   : > { %v1658_v2 = vmax.f32 %v1650_v1, 0.0 }
 0x7b4   : > { %2141 = vmatprep.mubr.msk.f32.mxu0 %vm1675_vm8, %v1658_v2 }
 0x7b5   : > { %2142 = vmatmul.mubr.msk.f32.vlgmr.msra.gmra.mrb[0].mxu0 %vm1675_vm8, %v1659_v3 }
 0x888   : > { %v2143_v6 = vpop.f32.mrb[0].mxu0 }
 0x889   : > { %v1754_v8 = vadd.f32 %v2143_v6, %v1972_v4  ;;  %v1748_v9 = vpop.f32.mrb[1].mxu0 }
 0x88a   : > { %v1749_v10 = vadd.f32 %v1972_v4, %v1748_v9 }
 0x88b   : > { %v1758_v11 = vadd.f32 %v1754_v8, %v1565_v57 }
 0x88c   : > { %v1757_v12 = vadd.f32 %v1749_v10, %v1564_v55 }
 0x88d   : > { %v1764_v13 = vsel %vm533_vm0, %v1758_v11, 0.0 }
 0x88e   : > { %1765 = vadd.xlane.f32.xlu1 %v1764_v13  ;;  %v1761_v14 = vsel %vm533_vm0, %v1757_v12, 0.0 }
 0x88f   : > { %1762 = vadd.xlane.f32.xlu0 %v1761_v14 }
 0x91b   : > { %v1766_v15 = vpop.xlane.xlu1 %1765 }
 0x91c   : > { %v1768_v16 = vmul.f32 0.03125, %v1766_v15  ;;  %v1763_v17 = vpop.xlane.xlu0 %1762 }
 0x91d   : > { %v1767_v18 = vmul.f32 0.03125, %v1763_v17 }
 0x91e   : > { %v1770_v19 = vsub.f32 %v1758_v11, %v1768_v16 }
 0x91f   : > { %v1769_v20 = vsub.f32 %v1757_v12, %v1767_v18 }
 0x920   : > { %v1772_v21 = vmul.f32 %v1770_v19, %v1770_v19 }
 0x921   : > { %v1771_v22 = vmul.f32 %v1769_v20, %v1769_v20 }
 0x922   : > { %v1776_v23 = vsel %vm533_vm0, %v1772_v21, 0.0 }
 0x923   : > { %1777 = vadd.xlane.f32.xlu1 %v1776_v23  ;;  %v1773_v24 = vsel %vm533_vm0, %v1771_v22, 0.0 }
 0x924   : > { %1774 = vadd.xlane.f32.xlu0 %v1773_v24 }
 0x9b0   : > { %v1778_v25 = vpop.xlane.xlu1 %1777 }
 0x9b1   : > { %v1780_v26 = vmul.f32 0.03125, %v1778_v25  ;;  %v1775_v27 = vpop.xlane.xlu0 %1774 }
 0x9b2   : > { %v1779_v5 = vmul.f32 0.03125, %v1775_v27 }
 0x9b3   : > { %v1782_v7 = vadd.f32 1e-05, %v1780_v26 }
 0x9b4   : > { %v1781_v28 = vadd.f32 1e-05, %v1779_v5 }
 0x9b5   : > { %2331 = vrsqrt.f32 %v1782_v7 }
 0x9b6   : > { %2333 = vrsqrt.f32 %v1781_v28 }
 0x9bf   : > { %v2332_v29 = vpop.eup %2331 }
 0x9c0   : > { %v2334_v31 = vpop.eup %2333  ;;  %v1786_v32 = vmul.f32 %v2332_v29, %v1770_v19 }
 0x9c1   : > { %v1785_v33 = vmul.f32 %v2334_v31, %v1769_v20 }
 0x9c2   : > { %v1794_v35 = vmul.f32 %v1975_v30, %v1786_v32 }
 0x9c3   : > { %v1793_v36 = vmul.f32 %v1975_v30, %v1785_v33 }
 0x9c4   : > { %v1802_v37 = vadd.f32 %v1976_v34, %v1794_v35 }
 0x9c5   : > { %v1801_v38 = vadd.f32 %v1976_v34, %v1793_v36 }
 0x9c6   : > { %1804 = vst.msk [vmem:[%s2813_s28 + $0x8] sm:$0xff] %vm533_vm0, %v1802_v37 }
 0x9c7   : > { %1803 = vst.msk [vmem:[%s2813_s28] sm:$0xff] %vm533_vm0, %v1801_v38 }
 0x9c8   : > { %2432 = shalt.err (!%p2429_p2)
}
 0x9c9   : > { %s2433_s16 = scalar_lea.hbm %s2958_s18, 256  ;;  %s2437_s22 = scalar_lea.hbm %s3061_s26, 512 }
 0x9ca   : > { %p2434_p3 = scmp.ne.s32.totalorder %s2958_s18, %s2433_s16  ;;  %p2438_p5 = scmp.lt.u32.totalorder %s2958_s18, %s3061_s26 }
 0x9cb   : > { %p2439_p10 = scmp.lt.u32.totalorder %s2437_s22, %s2433_s16  ;;  %p2441_p7 = scmp.lt.u32.totalorder %s2433_s16, %s2958_s18 }
 0x9cc   : > { %p2435_p0 = pnand %p2434_p3, %p3062_p8 }
 0x9cd   : > { %p2440_p12 = por %p2439_p10, %p2438_p5 }
 0x9ce   : > { %p2436_p4 = pneg %p2435_p0 }
 0x9cf   : > { %p2442_p11 = por %p2441_p7, %p2440_p12 }
 0x9d1   : > { %p2443_p13 = pnand %p2442_p11, %p2436_p4 }
 0x9d3   : > { %2446 = shalt.err (!%p2443_p13)
}
 0x9d4   : > { %s2522_s24 = smov 128   ;;  %s2523_s23 = smov 8  }
 0x9d5   : > { %2224 = dma.vmem_to_hbm [thread:$0]  (%p3062_p8), %s2960_s25, 256, %s2958_s18, %s2968_s17, %s2522_s24, %s2522_s24, %s2523_s23  }
 0x9d6 PF: > { %s3063_s14 = sld [smem:[#allocation18_spill]]  ;;  %s3064_s21 = sld [smem:[#allocation16_spill]] }
 0x9d7   : > { %s3065_s29 = sld [smem:[#allocation22_spill]] }
 0x9dc   : > { %p2246_p1 = scmp.ge.s32.totalorder %s3063_s14, 2  ;;  %s1834_s20 = sand.u32 1, %s3064_s21  }
 0x9dd   : > { %p3066_p6 = scmp.ne.s32.totalorder %s3065_s29, 0  ;;  %s1835_s27 = scalar_lea.sflag [#allocation8], %s1834_s20 }
 0x9df   : > { %p2237_p9 = pnand %p2246_p1, %p3066_p6 }
 0x9e1   : > { %2476 = dma.done.wait (!%p2237_p9), %s1835_s27, 256  }
 0x9e2   : > { %2478 = vsyncadd (!%p2237_p9), %s1835_s27, 4294967040  ;;  %s3067_s16 = sld [smem:[#allocation19_spill]]  ;;  %s3068_s28 = sld [smem:[#allocation17_spill]] }
 0x9e3   : > { %s3069_s15 = sld [smem:[#allocation20_spill]]  ;;  %s3070_s29 = smov %s2485_s30 }
 0x9e8   : > { %p26_p2 = scmp.ge.s32.totalorder %s3067_s16, 4   ;;  %s3071_s30 = smov %s3068_s28 }
 0x9ea   :  { %28 = sbr.rel (!%p26_p2) target bundleno = 9 (0x9), region = 156 }
 0x9f1   :  { %1840 = vsyncpa [#allocation7], 1 }
 0x9f2   :  { %1842 = vsyncpa [#allocation7 + $0x1], 1 }
 0x9f3   :  { %1843 = vsyncpa [#allocation10], 1 }
 0x9f4   :  { %1844 = vsyncpa [#allocation8], 1 }
 0x9f5   :  { %1846 = vsyncpa [#allocation8 + $0x1], 1 }

</bundles_post_ra>
